<compile_context>
chip_gen: v6e
topology: v6e:2x2x1
jax: 0.10.0
libtpu: 0.0.40
codegen_flags: <defaults>
</compile_context>

<pallas_src>
import jax
import jax.numpy as jnp
from jax import lax
from jax.experimental import pallas as pl
from jax.experimental.pallas import tpu as pltpu

# ---- "args" (small synthetic sizes consistent with the module) ----
EMB_DIM = 32          # args.emb_dim
TEXT_DIM = 64         # args.text_dim
IMG_DIM = 512         # CLIP image feature dim (hard-coded Linear(512, emb_dim))
HIDDEN = 512          # classifier hidden (hard-coded Linear(emb_dim, 512))
N_CITY = 16           # args.n_classes_city
N_COUNTRY = 8         # args.n_classes_country
N_CONTINENT = 4       # args.n_classes_continent
EPS = 1e-12           # Norm() clamp eps

N_LOGITS = N_CITY + N_COUNTRY + N_CONTINENT   # 28
PACKED_DIM = 128                              # 32 img | 32 txt | 28 logits | 36 pad
MAX_TB = 256                                  # batch-tile cap (VMEM-safe on v7x 64 MiB)


# ----------------------------- fused kernel -----------------------------

def _fused_forward_kernel(img_ref, txt_ref,
                          iw1_ref, ib1_ref, iw2_ref, ib2_ref,
                          tw1_ref, tb1_ref, tw2_ref, tb2_ref,
                          fwa_ref, fwb_ref, fb_ref,
                          cw1_ref, cb1_ref,
                          cty_w2_ref, cty_b2_ref,
                          ctr_w2_ref, ctr_b2_ref,
                          cnt_w2_ref, cnt_b2_ref,
                          o_ref):
    """Entire m_1bert_clip forward for one batch tile.

    o_ref lane layout (128 wide):
      [0:32)   image_emb
      [32:64)  text_emb
      [64:80)  city logits | [80:88) country logits | [88:92) continent logits
      [92:128) zeros (pad so the HBM store is one unmasked lane-dense tile)
    """
    f32 = jnp.float32

    def w(ref):  # bf16 storage -> f32 compute (DMA halved, math unchanged)
        return ref[...].astype(f32)

    def embed(x, w1_ref, b1_ref, w2_ref, b2_ref):
        # LearnImages / LearnText: Linear -> ReLU -> Linear -> Tanh -> L2 Norm
        h = jnp.dot(x, w(w1_ref), preferred_element_type=f32) + b1_ref[...]
        h = jnp.maximum(h, 0.0)
        y = jnp.tanh(jnp.dot(h, w(w2_ref), preferred_element_type=f32) + b2_ref[...])
        # y / max(||y||, EPS) == y * rsqrt(max(sum(y^2), EPS^2)) : single EUP op.
        return y * lax.rsqrt(jnp.maximum(jnp.sum(y * y, axis=1, keepdims=True), EPS * EPS))

    image_emb = embed(img_ref[...], iw1_ref, ib1_ref, iw2_ref, ib2_ref)
    text_emb = embed(txt_ref[...], tw1_ref, tb1_ref, tw2_ref, tb2_ref)

    # Fix_dim on cat([image_emb, text_emb], 1) == img @ W[:E] + txt @ W[E:] + b
    mm = (jnp.dot(image_emb, w(fwa_ref), preferred_element_type=f32)
          + jnp.dot(text_emb, w(fwb_ref), preferred_element_type=f32)
          + fb_ref[...])

    # Three Classify_* heads: one fused [B,32]x[32,1536] hidden matmul,
    # then three small per-head second-layer matmuls (no zero-padded weights).
    h = jnp.dot(mm, w(cw1_ref), preferred_element_type=f32) + cb1_ref[...]
    h = jnp.maximum(h, 0.0)                           # Dropout(eval) == identity

    city = jnp.dot(h[:, 0:HIDDEN], w(cty_w2_ref),
                   preferred_element_type=f32) + cty_b2_ref[...]
    country = jnp.dot(h[:, HIDDEN:2 * HIDDEN], w(ctr_w2_ref),
                      preferred_element_type=f32) + ctr_b2_ref[...]
    cont = jnp.dot(h[:, 2 * HIDDEN:3 * HIDDEN], w(cnt_w2_ref),
                   preferred_element_type=f32) + cnt_b2_ref[...]

    # Write the pieces straight into the lane-dense output block (no concat).
    base = 2 * EMB_DIM
    o_ref[:, 0:EMB_DIM] = image_emb
    o_ref[:, EMB_DIM:base] = text_emb
    o_ref[:, base:base + N_CITY] = city
    o_ref[:, base + N_CITY:base + N_CITY + N_COUNTRY] = country
    o_ref[:, base + N_CITY + N_COUNTRY:base + N_LOGITS] = cont
    o_ref[:, base + N_LOGITS:PACKED_DIM] = jnp.zeros(
        (o_ref.shape[0], PACKED_DIM - base - N_LOGITS), f32)


# --------------------------- pallas glue ---------------------------

def m_1bert_clip_forward(kp, image_input, text_input):
    B = image_input.shape[0]
    assert B % 8 == 0, "pad batch to a multiple of 8 (sublane)"
    TB = B if B <= MAX_TB else MAX_TB
    assert B % TB == 0, "pad batch to a multiple of the batch tile"
    nb = B // TB

    weights = (kp['img_w1'], kp['img_b1'], kp['img_w2'], kp['img_b2'],
               kp['txt_w1'], kp['txt_b1'], kp['txt_w2'], kp['txt_b2'],
               kp['fix_wa'], kp['fix_wb'], kp['fix_b'],
               kp['cls_w1'], kp['cls_b1'],
               kp['city_w2'], kp['city_b2'],
               kp['country_w2'], kp['country_b2'],
               kp['cont_w2'], kp['cont_b2'])

    # Inputs / output tile over batch; weights use a constant block index so
    # they are DMA'd once and stay VMEM-resident across all grid steps.
    in_specs = [pl.BlockSpec((TB, IMG_DIM), lambda i: (i, 0)),
                pl.BlockSpec((TB, TEXT_DIM), lambda i: (i, 0))]
    in_specs += [pl.BlockSpec(w_.shape, lambda i: (0, 0)) for w_ in weights]
    out_specs = pl.BlockSpec((TB, PACKED_DIM), lambda i: (i, 0))

    # Batch steps are independent -> "parallel" (v7x 2 TCs) once per-core work
    # exceeds the per-step overhead; at a single step keep "arbitrary".
    sem = ("parallel",) if (nb >= 2 and TB >= 128) else ("arbitrary",)

    packed = pl.pallas_call(
        _fused_forward_kernel,
        out_shape=jax.ShapeDtypeStruct((B, PACKED_DIM), jnp.float32),
        grid_spec=pltpu.PrefetchScalarGridSpec(
            num_scalar_prefetch=0,
            grid=(nb,),
            in_specs=in_specs,
            out_specs=out_specs),
        compiler_params=pltpu.CompilerParams(dimension_semantics=sem),
    )(image_input, text_input, *weights)

    image_emb = packed[:, 0:EMB_DIM]
    text_emb = packed[:, EMB_DIM:2 * EMB_DIM]
    base = 2 * EMB_DIM
    out_city = packed[:, base:base + N_CITY]
    out_country = packed[:, base + N_CITY:base + N_CITY + N_COUNTRY]
    out_continent = packed[:, base + N_CITY + N_COUNTRY:base + N_LOGITS]
    return out_city, out_country, out_continent, image_emb, text_emb


# -------------------------- params / model -------------------------

def init_params(key):
    """Reference parameters. Weights are round-tripped through bf16 so the
    kernel (bf16 weight storage) and the f32 reference use identical values."""
    def lin(k, din, dout):
        kw, kb = jax.random.split(k)
        bound = 1.0 / (din ** 0.5)
        w = jax.random.uniform(kw, (din, dout), jnp.float32, -bound, bound)
        w = w.astype(jnp.bfloat16).astype(jnp.float32)   # bf16-representable
        b = jax.random.uniform(kb, (1, dout), jnp.float32, -bound, bound)
        return w, b

    keys = jax.random.split(key, 11)
    p = {}
    p['img_w1'], p['img_b1'] = lin(keys[0], IMG_DIM, EMB_DIM)
    p['img_w2'], p['img_b2'] = lin(keys[1], EMB_DIM, EMB_DIM)
    p['txt_w1'], p['txt_b1'] = lin(keys[2], TEXT_DIM, EMB_DIM)
    p['txt_w2'], p['txt_b2'] = lin(keys[3], EMB_DIM, EMB_DIM)
    p['city_w1'], p['city_b1'] = lin(keys[4], EMB_DIM, HIDDEN)
    p['city_w2'], p['city_b2'] = lin(keys[5], HIDDEN, N_CITY)
    p['country_w1'], p['country_b1'] = lin(keys[6], EMB_DIM, HIDDEN)
    p['country_w2'], p['country_b2'] = lin(keys[7], HIDDEN, N_COUNTRY)
    p['cont_w1'], p['cont_b1'] = lin(keys[8], EMB_DIM, HIDDEN)
    p['cont_w2'], p['cont_b2'] = lin(keys[9], HIDDEN, N_CONTINENT)
    p['fix_w'], p['fix_b'] = lin(keys[10], 2 * EMB_DIM, EMB_DIM)
    return p


def pack_kernel_params(p):
    """Kernel-side parameters: bf16 weight storage (halves DMA), f32 biases,
    Fix_dim weight split for the concat, classifier hidden layers fused."""
    bf = lambda w_: w_.astype(jnp.bfloat16)   # lossless: values already bf16-representable
    kp = {
        'img_w1': bf(p['img_w1']), 'img_b1': p['img_b1'],
        'img_w2': bf(p['img_w2']), 'img_b2': p['img_b2'],
        'txt_w1': bf(p['txt_w1']), 'txt_b1': p['txt_b1'],
        'txt_w2': bf(p['txt_w2']), 'txt_b2': p['txt_b2'],
        'fix_wa': bf(p['fix_w'][:EMB_DIM]),    # acts on image_emb half of concat
        'fix_wb': bf(p['fix_w'][EMB_DIM:]),    # acts on text_emb half of concat
        'fix_b': p['fix_b'],
        # Hidden layers of the three heads side by side: [EMB_DIM, 3*HIDDEN].
        'cls_w1': bf(jnp.concatenate([p['city_w1'], p['country_w1'], p['cont_w1']], axis=1)),
        'cls_b1': jnp.concatenate([p['city_b1'], p['country_b1'], p['cont_b1']], axis=1),
        # Per-head second layers kept separate (no zero-padded block matrix).
        'city_w2': bf(p['city_w2']), 'city_b2': p['city_b2'],
        'country_w2': bf(p['country_w2']), 'country_b2': p['country_b2'],
        'cont_w2': bf(p['cont_w2']), 'cont_b2': p['cont_b2'],
    }
    return kp


# ------------------------- pure-JAX reference ----------------------

def _ref_forward(p, image_input, text_input):
    def emb(x, w1, b1, w2, b2):
        h = jnp.maximum(x @ w1 + b1, 0.0)
        y = jnp.tanh(h @ w2 + b2)
        n = jnp.maximum(jnp.sqrt(jnp.sum(y * y, axis=1, keepdims=True)), EPS)
        return y / n

    def cls(x, w1, b1, w2, b2):
        return jnp.maximum(x @ w1 + b1, 0.0) @ w2 + b2

    ie = emb(image_input, p['img_w1'], p['img_b1'], p['img_w2'], p['img_b2'])
    te = emb(text_input, p['txt_w1'], p['txt_b1'], p['txt_w2'], p['txt_b2'])
    mm = jnp.concatenate([ie, te], axis=1) @ p['fix_w'] + p['fix_b']
    return (cls(mm, p['city_w1'], p['city_b1'], p['city_w2'], p['city_b2']),
            cls(mm, p['country_w1'], p['country_b1'], p['country_w2'], p['country_b2']),
            cls(mm, p['cont_w1'], p['cont_b1'], p['cont_w2'], p['cont_b2']),
            ie, te)


# ------------------------------- main -------------------------------

if __name__ == "__main__":
    key = jax.random.PRNGKey(0)
    k_params, k_img, k_txt = jax.random.split(key, 3)

    B = 8
    image_input = jax.random.normal(k_img, (B, IMG_DIM), jnp.float32)
    text_input = jax.random.normal(k_txt, (B, TEXT_DIM), jnp.float32)

    params = init_params(k_params)
    kparams = pack_kernel_params(params)

    outs = m_1bert_clip_forward(kparams, image_input, text_input)
    outs = jax.block_until_ready(outs)

    refs = _ref_forward(params, image_input, text_input)
    for o, r in zip(outs, refs):
        assert o.shape == r.shape and o.dtype == r.dtype
        assert jnp.max(jnp.abs(o - r)) < 1e-4, jnp.max(jnp.abs(o - r))

    # TODO(synk): Dropout is eval-mode identity here; training-mode RNG masking
    # would need pltpu.prng_seed/prng_random_bits inside the kernel.
    print("KERNEL_OK")
</pallas_src>

<mosaic_0001>
module attributes {stable_mosaic.version = 11 : i64} {
  func.func @_fused_forward_kernel(%arg0: i32, %arg1: memref<8x512xf32, #tpu.memory_space<vmem>>, %arg2: memref<8x64xf32, #tpu.memory_space<vmem>>, %arg3: memref<512x32xbf16, #tpu.memory_space<vmem>>, %arg4: memref<1x32xf32, #tpu.memory_space<vmem>>, %arg5: memref<32x32xbf16, #tpu.memory_space<vmem>>, %arg6: memref<1x32xf32, #tpu.memory_space<vmem>>, %arg7: memref<64x32xbf16, #tpu.memory_space<vmem>>, %arg8: memref<1x32xf32, #tpu.memory_space<vmem>>, %arg9: memref<32x32xbf16, #tpu.memory_space<vmem>>, %arg10: memref<1x32xf32, #tpu.memory_space<vmem>>, %arg11: memref<32x32xbf16, #tpu.memory_space<vmem>>, %arg12: memref<32x32xbf16, #tpu.memory_space<vmem>>, %arg13: memref<1x32xf32, #tpu.memory_space<vmem>>, %arg14: memref<32x1536xbf16, #tpu.memory_space<vmem>>, %arg15: memref<1x1536xf32, #tpu.memory_space<vmem>>, %arg16: memref<512x16xbf16, #tpu.memory_space<vmem>>, %arg17: memref<1x16xf32, #tpu.memory_space<vmem>>, %arg18: memref<512x8xbf16, #tpu.memory_space<vmem>>, %arg19: memref<1x8xf32, #tpu.memory_space<vmem>>, %arg20: memref<512x4xbf16, #tpu.memory_space<vmem>>, %arg21: memref<1x4xf32, #tpu.memory_space<vmem>>, %arg22: memref<8x128xf32, #tpu.memory_space<vmem>>) attributes {dimension_semantics = [#tpu.dimension_semantics<arbitrary>], iteration_bounds = array<i64: 1>, scalar_prefetch = 0 : i64, scratch_operands = 0 : i64, tpu.core_type = #tpu.core_type<tc>, window_params = [{transform_indices = @transform_0, window_bounds = array<i64: 8, 512>}, {transform_indices = @transform_1, window_bounds = array<i64: 8, 64>}, {pipeline_mode = #tpu.pipeline_mode<synchronous>, transform_indices = @transform_2, window_bounds = array<i64: 512, 32>}, {pipeline_mode = #tpu.pipeline_mode<synchronous>, transform_indices = @transform_3, window_bounds = array<i64: 1, 32>}, {pipeline_mode = #tpu.pipeline_mode<synchronous>, transform_indices = @transform_4, window_bounds = array<i64: 32, 32>}, {pipeline_mode = #tpu.pipeline_mode<synchronous>, transform_indices = @transform_5, window_bounds = array<i64: 1, 32>}, {pipeline_mode = #tpu.pipeline_mode<synchronous>, transform_indices = @transform_6, window_bounds = array<i64: 64, 32>}, {pipeline_mode = #tpu.pipeline_mode<synchronous>, transform_indices = @transform_7, window_bounds = array<i64: 1, 32>}, {pipeline_mode = #tpu.pipeline_mode<synchronous>, transform_indices = @transform_8, window_bounds = array<i64: 32, 32>}, {pipeline_mode = #tpu.pipeline_mode<synchronous>, transform_indices = @transform_9, window_bounds = array<i64: 1, 32>}, {pipeline_mode = #tpu.pipeline_mode<synchronous>, transform_indices = @transform_10, window_bounds = array<i64: 32, 32>}, {pipeline_mode = #tpu.pipeline_mode<synchronous>, transform_indices = @transform_11, window_bounds = array<i64: 32, 32>}, {pipeline_mode = #tpu.pipeline_mode<synchronous>, transform_indices = @transform_12, window_bounds = array<i64: 1, 32>}, {pipeline_mode = #tpu.pipeline_mode<synchronous>, transform_indices = @transform_13, window_bounds = array<i64: 32, 1536>}, {pipeline_mode = #tpu.pipeline_mode<synchronous>, transform_indices = @transform_14, window_bounds = array<i64: 1, 1536>}, {pipeline_mode = #tpu.pipeline_mode<synchronous>, transform_indices = @transform_15, window_bounds = array<i64: 512, 16>}, {pipeline_mode = #tpu.pipeline_mode<synchronous>, transform_indices = @transform_16, window_bounds = array<i64: 1, 16>}, {pipeline_mode = #tpu.pipeline_mode<synchronous>, transform_indices = @transform_17, window_bounds = array<i64: 512, 8>}, {pipeline_mode = #tpu.pipeline_mode<synchronous>, transform_indices = @transform_18, window_bounds = array<i64: 1, 8>}, {pipeline_mode = #tpu.pipeline_mode<synchronous>, transform_indices = @transform_19, window_bounds = array<i64: 512, 4>}, {pipeline_mode = #tpu.pipeline_mode<synchronous>, transform_indices = @transform_20, window_bounds = array<i64: 1, 4>}, {transform_indices = @transform_21, window_bounds = array<i64: 8, 128>}]} {
    %c0 = arith.constant 0 : index
    %c0_0 = arith.constant 0 : index
    %0 = vector.load %arg1[%c0, %c0_0] : memref<8x512xf32, #tpu.memory_space<vmem>>, vector<8x512xf32>
    %c0_1 = arith.constant 0 : index
    %c0_2 = arith.constant 0 : index
    %1 = vector.load %arg3[%c0_1, %c0_2] : memref<512x32xbf16, #tpu.memory_space<vmem>>, vector<512x32xbf16>
    %2 = arith.extf %1 : vector<512x32xbf16> to vector<512x32xf32>
    %cst = arith.constant dense<0.000000e+00> : vector<8x32xf32>
    %3 = tpu.matmul %0, %2, %cst {dimension_numbers = #tpu.dot_dimension_numbers<[1], [0], [0], [1], [0, 0, 1, 1], [], []>} : vector<8x512xf32>, vector<512x32xf32>, vector<8x32xf32> -> vector<8x32xf32>
    %c0_3 = arith.constant 0 : index
    %c0_4 = arith.constant 0 : index
    %4 = vector.load %arg4[%c0_3, %c0_4] : memref<1x32xf32, #tpu.memory_space<vmem>>, vector<1x32xf32>
    %5 = vector.broadcast %4 : vector<1x32xf32> to vector<8x32xf32>
    %6 = arith.addf %3, %5 : vector<8x32xf32>
    %cst_5 = arith.constant 0.000000e+00 : f32
    %7 = vector.broadcast %cst_5 : f32 to vector<8x32xf32>
    %8 = arith.maximumf %6, %7 : vector<8x32xf32>
    %c0_6 = arith.constant 0 : index
    %c0_7 = arith.constant 0 : index
    %9 = vector.load %arg5[%c0_6, %c0_7] : memref<32x32xbf16, #tpu.memory_space<vmem>>, vector<32x32xbf16>
    %10 = arith.extf %9 : vector<32x32xbf16> to vector<32x32xf32>
    %cst_8 = arith.constant dense<0.000000e+00> : vector<8x32xf32>
    %11 = tpu.matmul %8, %10, %cst_8 {dimension_numbers = #tpu.dot_dimension_numbers<[1], [0], [0], [1], [0, 0, 1, 1], [], []>} : vector<8x32xf32>, vector<32x32xf32>, vector<8x32xf32> -> vector<8x32xf32>
    %c0_9 = arith.constant 0 : index
    %c0_10 = arith.constant 0 : index
    %12 = vector.load %arg6[%c0_9, %c0_10] : memref<1x32xf32, #tpu.memory_space<vmem>>, vector<1x32xf32>
    %13 = vector.broadcast %12 : vector<1x32xf32> to vector<8x32xf32>
    %14 = arith.addf %11, %13 : vector<8x32xf32>
    %15 = math.tanh %14 : vector<8x32xf32>
    %16 = arith.mulf %15, %15 : vector<8x32xf32>
    %cst_11 = arith.constant dense<0.000000e+00> : vector<8xf32>
    %17 = vector.multi_reduction <add>, %16, %cst_11 [1] : vector<8x32xf32> to vector<8xf32>
    %18 = vector.shape_cast %17 : vector<8xf32> to vector<8x1xf32>
    %cst_12 = arith.constant 1.000000e-24 : f32
    %19 = vector.broadcast %cst_12 : f32 to vector<8x1xf32>
    %20 = arith.maximumf %18, %19 : vector<8x1xf32>
    %21 = math.rsqrt %20 : vector<8x1xf32>
    %22 = vector.broadcast %21 : vector<8x1xf32> to vector<8x32xf32>
    %23 = arith.mulf %15, %22 : vector<8x32xf32>
    %c0_13 = arith.constant 0 : index
    %c0_14 = arith.constant 0 : index
    %24 = vector.load %arg2[%c0_13, %c0_14] : memref<8x64xf32, #tpu.memory_space<vmem>>, vector<8x64xf32>
    %c0_15 = arith.constant 0 : index
    %c0_16 = arith.constant 0 : index
    %25 = vector.load %arg7[%c0_15, %c0_16] : memref<64x32xbf16, #tpu.memory_space<vmem>>, vector<64x32xbf16>
    %26 = arith.extf %25 : vector<64x32xbf16> to vector<64x32xf32>
    %cst_17 = arith.constant dense<0.000000e+00> : vector<8x32xf32>
    %27 = tpu.matmul %24, %26, %cst_17 {dimension_numbers = #tpu.dot_dimension_numbers<[1], [0], [0], [1], [0, 0, 1, 1], [], []>} : vector<8x64xf32>, vector<64x32xf32>, vector<8x32xf32> -> vector<8x32xf32>
    %c0_18 = arith.constant 0 : index
    %c0_19 = arith.constant 0 : index
    %28 = vector.load %arg8[%c0_18, %c0_19] : memref<1x32xf32, #tpu.memory_space<vmem>>, vector<1x32xf32>
    %29 = vector.broadcast %28 : vector<1x32xf32> to vector<8x32xf32>
    %30 = arith.addf %27, %29 : vector<8x32xf32>
    %cst_20 = arith.constant 0.000000e+00 : f32
    %31 = vector.broadcast %cst_20 : f32 to vector<8x32xf32>
    %32 = arith.maximumf %30, %31 : vector<8x32xf32>
    %c0_21 = arith.constant 0 : index
    %c0_22 = arith.constant 0 : index
    %33 = vector.load %arg9[%c0_21, %c0_22] : memref<32x32xbf16, #tpu.memory_space<vmem>>, vector<32x32xbf16>
    %34 = arith.extf %33 : vector<32x32xbf16> to vector<32x32xf32>
    %cst_23 = arith.constant dense<0.000000e+00> : vector<8x32xf32>
    %35 = tpu.matmul %32, %34, %cst_23 {dimension_numbers = #tpu.dot_dimension_numbers<[1], [0], [0], [1], [0, 0, 1, 1], [], []>} : vector<8x32xf32>, vector<32x32xf32>, vector<8x32xf32> -> vector<8x32xf32>
    %c0_24 = arith.constant 0 : index
    %c0_25 = arith.constant 0 : index
    %36 = vector.load %arg10[%c0_24, %c0_25] : memref<1x32xf32, #tpu.memory_space<vmem>>, vector<1x32xf32>
    %37 = vector.broadcast %36 : vector<1x32xf32> to vector<8x32xf32>
    %38 = arith.addf %35, %37 : vector<8x32xf32>
    %39 = math.tanh %38 : vector<8x32xf32>
    %40 = arith.mulf %39, %39 : vector<8x32xf32>
    %cst_26 = arith.constant dense<0.000000e+00> : vector<8xf32>
    %41 = vector.multi_reduction <add>, %40, %cst_26 [1] : vector<8x32xf32> to vector<8xf32>
    %42 = vector.shape_cast %41 : vector<8xf32> to vector<8x1xf32>
    %cst_27 = arith.constant 1.000000e-24 : f32
    %43 = vector.broadcast %cst_27 : f32 to vector<8x1xf32>
    %44 = arith.maximumf %42, %43 : vector<8x1xf32>
    %45 = math.rsqrt %44 : vector<8x1xf32>
    %46 = vector.broadcast %45 : vector<8x1xf32> to vector<8x32xf32>
    %47 = arith.mulf %39, %46 : vector<8x32xf32>
    %c0_28 = arith.constant 0 : index
    %c0_29 = arith.constant 0 : index
    %48 = vector.load %arg11[%c0_28, %c0_29] : memref<32x32xbf16, #tpu.memory_space<vmem>>, vector<32x32xbf16>
    %49 = arith.extf %48 : vector<32x32xbf16> to vector<32x32xf32>
    %cst_30 = arith.constant dense<0.000000e+00> : vector<8x32xf32>
    %50 = tpu.matmul %23, %49, %cst_30 {dimension_numbers = #tpu.dot_dimension_numbers<[1], [0], [0], [1], [0, 0, 1, 1], [], []>} : vector<8x32xf32>, vector<32x32xf32>, vector<8x32xf32> -> vector<8x32xf32>
    %c0_31 = arith.constant 0 : index
    %c0_32 = arith.constant 0 : index
    %51 = vector.load %arg12[%c0_31, %c0_32] : memref<32x32xbf16, #tpu.memory_space<vmem>>, vector<32x32xbf16>
    %52 = arith.extf %51 : vector<32x32xbf16> to vector<32x32xf32>
    %cst_33 = arith.constant dense<0.000000e+00> : vector<8x32xf32>
    %53 = tpu.matmul %47, %52, %cst_33 {dimension_numbers = #tpu.dot_dimension_numbers<[1], [0], [0], [1], [0, 0, 1, 1], [], []>} : vector<8x32xf32>, vector<32x32xf32>, vector<8x32xf32> -> vector<8x32xf32>
    %54 = arith.addf %50, %53 : vector<8x32xf32>
    %c0_34 = arith.constant 0 : index
    %c0_35 = arith.constant 0 : index
    %55 = vector.load %arg13[%c0_34, %c0_35] : memref<1x32xf32, #tpu.memory_space<vmem>>, vector<1x32xf32>
    %56 = vector.broadcast %55 : vector<1x32xf32> to vector<8x32xf32>
    %57 = arith.addf %54, %56 : vector<8x32xf32>
    %c0_36 = arith.constant 0 : index
    %c0_37 = arith.constant 0 : index
    %58 = vector.load %arg14[%c0_36, %c0_37] : memref<32x1536xbf16, #tpu.memory_space<vmem>>, vector<32x1536xbf16>
    %59 = arith.extf %58 : vector<32x1536xbf16> to vector<32x1536xf32>
    %cst_38 = arith.constant dense<0.000000e+00> : vector<8x1536xf32>
    %60 = tpu.matmul %57, %59, %cst_38 {dimension_numbers = #tpu.dot_dimension_numbers<[1], [0], [0], [1], [0, 0, 1, 1], [], []>} : vector<8x32xf32>, vector<32x1536xf32>, vector<8x1536xf32> -> vector<8x1536xf32>
    %c0_39 = arith.constant 0 : index
    %c0_40 = arith.constant 0 : index
    %61 = vector.load %arg15[%c0_39, %c0_40] : memref<1x1536xf32, #tpu.memory_space<vmem>>, vector<1x1536xf32>
    %62 = vector.broadcast %61 : vector<1x1536xf32> to vector<8x1536xf32>
    %63 = arith.addf %60, %62 : vector<8x1536xf32>
    %cst_41 = arith.constant 0.000000e+00 : f32
    %64 = vector.broadcast %cst_41 : f32 to vector<8x1536xf32>
    %65 = arith.maximumf %63, %64 : vector<8x1536xf32>
    %66 = vector.extract_strided_slice %65 {offsets = [0, 0], sizes = [8, 512], strides = [1, 1]} : vector<8x1536xf32> to vector<8x512xf32>
    %c0_42 = arith.constant 0 : index
    %c0_43 = arith.constant 0 : index
    %67 = vector.load %arg16[%c0_42, %c0_43] : memref<512x16xbf16, #tpu.memory_space<vmem>>, vector<512x16xbf16>
    %68 = arith.extf %67 : vector<512x16xbf16> to vector<512x16xf32>
    %cst_44 = arith.constant dense<0.000000e+00> : vector<8x16xf32>
    %69 = tpu.matmul %66, %68, %cst_44 {dimension_numbers = #tpu.dot_dimension_numbers<[1], [0], [0], [1], [0, 0, 1, 1], [], []>} : vector<8x512xf32>, vector<512x16xf32>, vector<8x16xf32> -> vector<8x16xf32>
    %c0_45 = arith.constant 0 : index
    %c0_46 = arith.constant 0 : index
    %70 = vector.load %arg17[%c0_45, %c0_46] : memref<1x16xf32, #tpu.memory_space<vmem>>, vector<1x16xf32>
    %71 = vector.broadcast %70 : vector<1x16xf32> to vector<8x16xf32>
    %72 = arith.addf %69, %71 : vector<8x16xf32>
    %73 = vector.extract_strided_slice %65 {offsets = [0, 512], sizes = [8, 512], strides = [1, 1]} : vector<8x1536xf32> to vector<8x512xf32>
    %c0_47 = arith.constant 0 : index
    %c0_48 = arith.constant 0 : index
    %74 = vector.load %arg18[%c0_47, %c0_48] : memref<512x8xbf16, #tpu.memory_space<vmem>>, vector<512x8xbf16>
    %75 = arith.extf %74 : vector<512x8xbf16> to vector<512x8xf32>
    %cst_49 = arith.constant dense<0.000000e+00> : vector<8x8xf32>
    %76 = tpu.matmul %73, %75, %cst_49 {dimension_numbers = #tpu.dot_dimension_numbers<[1], [0], [0], [1], [0, 0, 1, 1], [], []>} : vector<8x512xf32>, vector<512x8xf32>, vector<8x8xf32> -> vector<8x8xf32>
    %c0_50 = arith.constant 0 : index
    %c0_51 = arith.constant 0 : index
    %77 = vector.load %arg19[%c0_50, %c0_51] : memref<1x8xf32, #tpu.memory_space<vmem>>, vector<1x8xf32>
    %78 = vector.broadcast %77 : vector<1x8xf32> to vector<8x8xf32>
    %79 = arith.addf %76, %78 : vector<8x8xf32>
    %80 = vector.extract_strided_slice %65 {offsets = [0, 1024], sizes = [8, 512], strides = [1, 1]} : vector<8x1536xf32> to vector<8x512xf32>
    %c0_52 = arith.constant 0 : index
    %c0_53 = arith.constant 0 : index
    %81 = vector.load %arg20[%c0_52, %c0_53] : memref<512x4xbf16, #tpu.memory_space<vmem>>, vector<512x4xbf16>
    %82 = arith.extf %81 : vector<512x4xbf16> to vector<512x4xf32>
    %cst_54 = arith.constant dense<0.000000e+00> : vector<8x4xf32>
    %83 = tpu.matmul %80, %82, %cst_54 {dimension_numbers = #tpu.dot_dimension_numbers<[1], [0], [0], [1], [0, 0, 1, 1], [], []>} : vector<8x512xf32>, vector<512x4xf32>, vector<8x4xf32> -> vector<8x4xf32>
    %c0_55 = arith.constant 0 : index
    %c0_56 = arith.constant 0 : index
    %84 = vector.load %arg21[%c0_55, %c0_56] : memref<1x4xf32, #tpu.memory_space<vmem>>, vector<1x4xf32>
    %85 = vector.broadcast %84 : vector<1x4xf32> to vector<8x4xf32>
    %86 = arith.addf %83, %85 : vector<8x4xf32>
    %c0_57 = arith.constant 0 : index
    %c0_58 = arith.constant 0 : index
    %87 = vector.load %arg22[%c0_57, %c0_58] : memref<8x128xf32, #tpu.memory_space<vmem>>, vector<8x32xf32>
    tpu.vector_store %arg22[%c0_57, %c0_58], %23 {strides = array<i32>} : memref<8x128xf32, #tpu.memory_space<vmem>>, vector<8x32xf32>,
    %c0_59 = arith.constant 0 : index
    %c32 = arith.constant 32 : index
    %88 = vector.load %arg22[%c0_59, %c32] : memref<8x128xf32, #tpu.memory_space<vmem>>, vector<8x32xf32>
    tpu.vector_store %arg22[%c0_59, %c32], %47 {strides = array<i32>} : memref<8x128xf32, #tpu.memory_space<vmem>>, vector<8x32xf32>,
    %c0_60 = arith.constant 0 : index
    %c64 = arith.constant 64 : index
    %89 = vector.load %arg22[%c0_60, %c64] : memref<8x128xf32, #tpu.memory_space<vmem>>, vector<8x16xf32>
    tpu.vector_store %arg22[%c0_60, %c64], %72 {strides = array<i32>} : memref<8x128xf32, #tpu.memory_space<vmem>>, vector<8x16xf32>,
    %c0_61 = arith.constant 0 : index
    %c80 = arith.constant 80 : index
    %90 = vector.load %arg22[%c0_61, %c80] : memref<8x128xf32, #tpu.memory_space<vmem>>, vector<8x8xf32>
    tpu.vector_store %arg22[%c0_61, %c80], %79 {strides = array<i32>} : memref<8x128xf32, #tpu.memory_space<vmem>>, vector<8x8xf32>,
    %c0_62 = arith.constant 0 : index
    %c88 = arith.constant 88 : index
    %91 = vector.load %arg22[%c0_62, %c88] : memref<8x128xf32, #tpu.memory_space<vmem>>, vector<8x4xf32>
    tpu.vector_store %arg22[%c0_62, %c88], %86 {strides = array<i32>} : memref<8x128xf32, #tpu.memory_space<vmem>>, vector<8x4xf32>,
    %cst_63 = arith.constant 0.000000e+00 : f32
    %92 = vector.broadcast %cst_63 : f32 to vector<8x36xf32>
    %c0_64 = arith.constant 0 : index
    %c92 = arith.constant 92 : index
    %93 = vector.load %arg22[%c0_64, %c92] : memref<8x128xf32, #tpu.memory_space<vmem>>, vector<8x36xf32>
    tpu.vector_store %arg22[%c0_64, %c92], %92 {strides = array<i32>} : memref<8x128xf32, #tpu.memory_space<vmem>>, vector<8x36xf32>,
    return
  }
  func.func @transform_0(%arg0: i32) -> (i32, i32) {
    %c0_i32 = arith.constant 0 : i32
    %c0_i32_0 = arith.constant 0 : i32
    return %arg0, %c0_i32 : i32, i32
  }
  func.func @transform_1(%arg0: i32) -> (i32, i32) {
    %c0_i32 = arith.constant 0 : i32
    %c0_i32_0 = arith.constant 0 : i32
    return %arg0, %c0_i32 : i32, i32
  }
  func.func @transform_2(%arg0: i32) -> (i32, i32) {
    %c0_i32 = arith.constant 0 : i32
    %c0_i32_0 = arith.constant 0 : i32
    %c0_i32_1 = arith.constant 0 : i32
    return %c0_i32, %c0_i32_0 : i32, i32
  }
  func.func @transform_3(%arg0: i32) -> (i32, i32) {
    %c0_i32 = arith.constant 0 : i32
    %c0_i32_0 = arith.constant 0 : i32
    %c0_i32_1 = arith.constant 0 : i32
    return %c0_i32, %c0_i32_0 : i32, i32
  }
  func.func @transform_4(%arg0: i32) -> (i32, i32) {
    %c0_i32 = arith.constant 0 : i32
    %c0_i32_0 = arith.constant 0 : i32
    %c0_i32_1 = arith.constant 0 : i32
    return %c0_i32, %c0_i32_0 : i32, i32
  }
  func.func @transform_5(%arg0: i32) -> (i32, i32) {
    %c0_i32 = arith.constant 0 : i32
    %c0_i32_0 = arith.constant 0 : i32
    %c0_i32_1 = arith.constant 0 : i32
    return %c0_i32, %c0_i32_0 : i32, i32
  }
  func.func @transform_6(%arg0: i32) -> (i32, i32) {
    %c0_i32 = arith.constant 0 : i32
    %c0_i32_0 = arith.constant 0 : i32
    %c0_i32_1 = arith.constant 0 : i32
    return %c0_i32, %c0_i32_0 : i32, i32
  }
  func.func @transform_7(%arg0: i32) -> (i32, i32) {
    %c0_i32 = arith.constant 0 : i32
    %c0_i32_0 = arith.constant 0 : i32
    %c0_i32_1 = arith.constant 0 : i32
    return %c0_i32, %c0_i32_0 : i32, i32
  }
  func.func @transform_8(%arg0: i32) -> (i32, i32) {
    %c0_i32 = arith.constant 0 : i32
    %c0_i32_0 = arith.constant 0 : i32
    %c0_i32_1 = arith.constant 0 : i32
    return %c0_i32, %c0_i32_0 : i32, i32
  }
  func.func @transform_9(%arg0: i32) -> (i32, i32) {
    %c0_i32 = arith.constant 0 : i32
    %c0_i32_0 = arith.constant 0 : i32
    %c0_i32_1 = arith.constant 0 : i32
    return %c0_i32, %c0_i32_0 : i32, i32
  }
  func.func @transform_10(%arg0: i32) -> (i32, i32) {
    %c0_i32 = arith.constant 0 : i32
    %c0_i32_0 = arith.constant 0 : i32
    %c0_i32_1 = arith.constant 0 : i32
    return %c0_i32, %c0_i32_0 : i32, i32
  }
  func.func @transform_11(%arg0: i32) -> (i32, i32) {
    %c0_i32 = arith.constant 0 : i32
    %c0_i32_0 = arith.constant 0 : i32
    %c0_i32_1 = arith.constant 0 : i32
    return %c0_i32, %c0_i32_0 : i32, i32
  }
  func.func @transform_12(%arg0: i32) -> (i32, i32) {
    %c0_i32 = arith.constant 0 : i32
    %c0_i32_0 = arith.constant 0 : i32
    %c0_i32_1 = arith.constant 0 : i32
    return %c0_i32, %c0_i32_0 : i32, i32
  }
  func.func @transform_13(%arg0: i32) -> (i32, i32) {
    %c0_i32 = arith.constant 0 : i32
    %c0_i32_0 = arith.constant 0 : i32
    %c0_i32_1 = arith.constant 0 : i32
    return %c0_i32, %c0_i32_0 : i32, i32
  }
  func.func @transform_14(%arg0: i32) -> (i32, i32) {
    %c0_i32 = arith.constant 0 : i32
    %c0_i32_0 = arith.constant 0 : i32
    %c0_i32_1 = arith.constant 0 : i32
    return %c0_i32, %c0_i32_0 : i32, i32
  }
  func.func @transform_15(%arg0: i32) -> (i32, i32) {
    %c0_i32 = arith.constant 0 : i32
    %c0_i32_0 = arith.constant 0 : i32
    %c0_i32_1 = arith.constant 0 : i32
    return %c0_i32, %c0_i32_0 : i32, i32
  }
  func.func @transform_16(%arg0: i32) -> (i32, i32) {
    %c0_i32 = arith.constant 0 : i32
    %c0_i32_0 = arith.constant 0 : i32
    %c0_i32_1 = arith.constant 0 : i32
    return %c0_i32, %c0_i32_0 : i32, i32
  }
  func.func @transform_17(%arg0: i32) -> (i32, i32) {
    %c0_i32 = arith.constant 0 : i32
    %c0_i32_0 = arith.constant 0 : i32
    %c0_i32_1 = arith.constant 0 : i32
    return %c0_i32, %c0_i32_0 : i32, i32
  }
  func.func @transform_18(%arg0: i32) -> (i32, i32) {
    %c0_i32 = arith.constant 0 : i32
    %c0_i32_0 = arith.constant 0 : i32
    %c0_i32_1 = arith.constant 0 : i32
    return %c0_i32, %c0_i32_0 : i32, i32
  }
  func.func @transform_19(%arg0: i32) -> (i32, i32) {
    %c0_i32 = arith.constant 0 : i32
    %c0_i32_0 = arith.constant 0 : i32
    %c0_i32_1 = arith.constant 0 : i32
    return %c0_i32, %c0_i32_0 : i32, i32
  }
  func.func @transform_20(%arg0: i32) -> (i32, i32) {
    %c0_i32 = arith.constant 0 : i32
    %c0_i32_0 = arith.constant 0 : i32
    %c0_i32_1 = arith.constant 0 : i32
    return %c0_i32, %c0_i32_0 : i32, i32
  }
  func.func @transform_21(%arg0: i32) -> (i32, i32) {
    %c0_i32 = arith.constant 0 : i32
    %c0_i32_0 = arith.constant 0 : i32
    return %arg0, %c0_i32 : i32, i32
  }
}

</mosaic_0001>

<bundles_post_ra>
// kernel: tpu_custom_call.1
= control target key start
LH: loop header
LB: loop body
LE: loop exit
PB: predicated region body
PF: predicated region fallthrough
CT: control target
= control target key end

     0   :  { %s4145_s0 = inlined_call_operand.vmem [shape: f32[8,512], index: 0, kind: input, shape index: {}]   ;;  %s4146_s1 = inlined_call_operand.vmem [shape: f32[8,64], index: 1, kind: input, shape index: {}]   ;;  %s4147_s2 = inlined_call_operand.vmem [shape: bf16[512,32], index: 2, kind: input, shape index: {}]   ;;  %s4148_s3 = inlined_call_operand.vmem [shape: f32[1,32], index: 3, kind: input, shape index: {}]   ;;  %s4149_s4 = inlined_call_operand.vmem [shape: bf16[32,32], index: 4, kind: input, shape index: {}]   ;;  %s4150_s5 = inlined_call_operand.vmem [shape: f32[1,32], index: 5, kind: input, shape index: {}]   ;;  %s4151_s6 = inlined_call_operand.vmem [shape: bf16[64,32], index: 6, kind: input, shape index: {}]   ;;  %s4152_s7 = inlined_call_operand.vmem [shape: f32[1,32], index: 7, kind: input, shape index: {}]   ;;  %s4153_s8 = inlined_call_operand.vmem [shape: bf16[32,32], index: 8, kind: input, shape index: {}]   ;;  %s4154_s9 = inlined_call_operand.vmem [shape: f32[1,32], index: 9, kind: input, shape index: {}]   ;;  %s4155_s10 = inlined_call_operand.vmem [shape: bf16[32,32], index: 10, kind: input, shape index: {}]   ;;  %s4156_s11 = inlined_call_operand.vmem [shape: bf16[32,32], index: 11, kind: input, shape index: {}]   ;;  %s4157_s12 = inlined_call_operand.vmem [shape: f32[1,32], index: 12, kind: input, shape index: {}]   ;;  %s4158_s13 = inlined_call_operand.vmem [shape: bf16[32,1536], index: 13, kind: input, shape index: {}]   ;;  %s4159_s14 = inlined_call_operand.vmem [shape: f32[1,1536], index: 14, kind: input, shape index: {}]   ;;  %s4160_s15 = inlined_call_operand.vmem [shape: bf16[512,16], index: 15, kind: input, shape index: {}]   ;;  %s4161_s16 = inlined_call_operand.vmem [shape: f32[1,16], index: 16, kind: input, shape index: {}]   ;;  %s4162_s17 = inlined_call_operand.vmem [shape: bf16[512,8], index: 17, kind: input, shape index: {}]   ;;  %s4163_s18 = inlined_call_operand.vmem [shape: f32[1,8], index: 18, kind: input, shape index: {}]   ;;  %s4164_s19 = inlined_call_operand.vmem [shape: bf16[512,4], index: 19, kind: input, shape index: {}]   ;;  %s4165_s20 = inlined_call_operand.vmem [shape: f32[1,4], index: 20, kind: input, shape index: {}]   ;;  %s4166_s21 = inlined_call_operand.hbm [shape: f32[8,128], index: 21, kind: output, shape index: {}]  }
   0x1   :  { %4170 = sst [smem:[#allocation5_spill]] %s4145_s0 }
   0x2   :  { %4171 = sst [smem:[#allocation6_spill]] %s4146_s1 }
   0x3   :  { %4172 = sst [smem:[#allocation7_spill]] %s4147_s2 }
   0x4   :  { %4173 = sst [smem:[#allocation8_spill]] %s4148_s3 }
   0x5   :  { %4174 = sst [smem:[#allocation9_spill]] %s4149_s4 }
   0x6   :  { %4175 = sst [smem:[#allocation10_spill]] %s4150_s5 }
   0x7   :  { %s4176_s26 = sld [smem:[#allocation7_spill]] }
   0xd   :  { %v2846_v0 = vld [vmem:[%s4176_s26 + $0x78] sm:$0xff]   ;;  %v2845_v8 = vld [vmem:[%s4176_s26 + $0x70] sm:$0xff]   ;;  %v2844_v20 = vld [vmem:[%s4176_s26 + $0x68] sm:$0xff]  }
   0xe   :  { %v2862_v1 = vld [vmem:[%s4176_s26 + $0xf8] sm:$0xff]   ;;  %v2334_v3 = vunpack.c.l.bf16 %v2846_v0  ;;  %v2335_v4 = vunpack.c.h.bf16 %v2846_v0  ;;  %v2861_v9 = vld [vmem:[%s4176_s26 + $0xf0] sm:$0xff]   ;;  %v2331_v16 = vunpack.c.h.bf16 %v2845_v8  ;;  %v2860_v21 = vld [vmem:[%s4176_s26 + $0xe8] sm:$0xff]   ;;  %v2330_v22 = vunpack.c.l.bf16 %v2845_v8 }
   0xf   :  { %v2838_v2 = vld [vmem:[%s4176_s26 + $0x38] sm:$0xff]   ;;  %v2398_v5 = vunpack.c.l.bf16 %v2862_v1  ;;  %v2399_v6 = vunpack.c.h.bf16 %v2862_v1  ;;  %v2837_v14 = vld [vmem:[%s4176_s26 + $0x30] sm:$0xff]   ;;  %v2395_v17 = vunpack.c.h.bf16 %v2861_v9  ;;  %v2394_v23 = vunpack.c.l.bf16 %v2861_v9  ;;  %v2836_v24 = vld [vmem:[%s4176_s26 + $0x28] sm:$0xff]  }
  0x10   :  { %v2854_v7 = vld [vmem:[%s4176_s26 + $0xb8] sm:$0xff]   ;;  %v2302_v10 = vunpack.c.l.bf16 %v2838_v2  ;;  %v2303_v11 = vunpack.c.h.bf16 %v2838_v2  ;;  %v2853_v15 = vld [vmem:[%s4176_s26 + $0xb0] sm:$0xff]   ;;  %2963 = vmatprep.subr.mxu0 %v2335_v4  ;;  %v2299_v18 = vunpack.c.h.bf16 %v2837_v14  ;;  %v2852_v25 = vld [vmem:[%s4176_s26 + $0xa8] sm:$0xff]   ;;  %v2298_v26 = vunpack.c.l.bf16 %v2837_v14 }
  0x11   :  { %v2366_v12 = vunpack.c.l.bf16 %v2854_v7  ;;  %v2367_v13 = vunpack.c.h.bf16 %v2854_v7  ;;  %2998 = vmatprep.subr.mxu1 %v2399_v6  ;;  %v2363_v19 = vunpack.c.h.bf16 %v2853_v15  ;;  %v2362_v27 = vunpack.c.l.bf16 %v2853_v15  ;;  %v2843_v32 = vld [vmem:[%s4176_s26 + $0x60] sm:$0xff]   ;;  %v2842_v44 = vld [vmem:[%s4176_s26 + $0x58] sm:$0xff]  }
  0x12   :  { %2964 = vmatpush3.msra.mxu0 %v2303_v11  ;;  %v2327_v28 = vunpack.c.h.bf16 %v2844_v20  ;;  %v2391_v29 = vunpack.c.h.bf16 %v2860_v21  ;;  %v2295_v30 = vunpack.c.h.bf16 %v2836_v24  ;;  %v2359_v31 = vunpack.c.h.bf16 %v2852_v25  ;;  %v2859_v33 = vld [vmem:[%s4176_s26 + $0xe0] sm:$0xff]   ;;  %v2858_v45 = vld [vmem:[%s4176_s26 + $0xd8] sm:$0xff]  }
  0x13   :  { %2999 = vmatpush3.msra.mxu1 %v2367_v13  ;;  %2965 = vmatprep.subr.mxu0 %v2334_v3  ;;  %v2326_v34 = vunpack.c.l.bf16 %v2844_v20  ;;  %v2390_v35 = vunpack.c.l.bf16 %v2860_v21  ;;  %v2835_v36 = vld [vmem:[%s4176_s26 + $0x20] sm:$0xff]   ;;  %v2294_v38 = vunpack.c.l.bf16 %v2836_v24  ;;  %v2358_v39 = vunpack.c.l.bf16 %v2852_v25  ;;  %v2834_v48 = vld [vmem:[%s4176_s26 + $0x18] sm:$0xff]  }
  0x14   :  { %3000 = vmatprep.subr.mxu1 %v2398_v5  ;;  %2966 = vmatpush3.msra.mxu0 %v2302_v10  ;;  %v2851_v37 = vld [vmem:[%s4176_s26 + $0xa0] sm:$0xff]   ;;  %v2323_v40 = vunpack.c.h.bf16 %v2843_v32  ;;  %v2387_v41 = vunpack.c.h.bf16 %v2859_v33  ;;  %v2291_v42 = vunpack.c.h.bf16 %v2835_v36  ;;  %v2322_v46 = vunpack.c.l.bf16 %v2843_v32  ;;  %v2850_v49 = vld [vmem:[%s4176_s26 + $0x98] sm:$0xff]  }
  0x15   :  { %3001 = vmatpush3.msra.mxu1 %v2366_v12  ;;  %2967 = vmatprep.subr.mxu0 %v2331_v16  ;;  %v2355_v43 = vunpack.c.h.bf16 %v2851_v37  ;;  %v2386_v47 = vunpack.c.l.bf16 %v2859_v33 }
  0x16   :  { %3002 = vmatprep.subr.mxu1 %v2395_v17  ;;  %2968 = vmatpush3.msra.mxu0 %v2299_v18 }
  0x17   :  { %3003 = vmatpush3.msra.mxu1 %v2363_v19  ;;  %2969 = vmatprep.subr.mxu0 %v2330_v22 }
  0x18   :  { %3004 = vmatprep.subr.mxu1 %v2394_v23  ;;  %2970 = vmatpush3.msra.mxu0 %v2298_v26 }
  0x19   :  { %3005 = vmatpush3.msra.mxu1 %v2362_v27  ;;  %2971 = vmatprep.subr.mxu0 %v2327_v28 }
  0x1a   :  { %3006 = vmatprep.subr.mxu1 %v2391_v29  ;;  %2972 = vmatpush3.msra.mxu0 %v2295_v30 }
  0x1b   :  { %3007 = vmatpush3.msra.mxu1 %v2359_v31  ;;  %2973 = vmatprep.subr.mxu0 %v2326_v34 }
  0x1c   :  { %3008 = vmatprep.subr.mxu1 %v2390_v35 }
  0x1d   :  { %26 = vsyncpa [#allocation3], 0  ;;  %2974 = vmatpush3.msra.mxu0 %v2294_v38  ;;  %3009 = vmatpush3.msra.mxu1 %v2358_v39  ;;  %v2290_v50 = vunpack.c.l.bf16 %v2835_v36  ;;  %v2354_v51 = vunpack.c.l.bf16 %v2851_v37  ;;  %v2319_v52 = vunpack.c.h.bf16 %v2842_v44  ;;  %v2383_v53 = vunpack.c.h.bf16 %v2858_v45  ;;  %v2841_v56 = vld [vmem:[%s4176_s26 + $0x50] sm:$0xff]   ;;  %v2840_v4 = vld [vmem:[%s4176_s26 + $0x48] sm:$0xff]   ;;  %s4177_s5 = sld [smem:[#allocation5_spill]]  ;;  %s3375_s22 = smov 64  }
  0x1e   :  { %2975 = vmatprep.subr.mxu0 %v2323_v40  ;;  %3010 = vmatprep.subr.mxu1 %v2387_v41  ;;  %v2287_v54 = vunpack.c.h.bf16 %v2834_v48  ;;  %v2351_v55 = vunpack.c.h.bf16 %v2850_v49  ;;  %v2857_v57 = vld [vmem:[%s4176_s26 + $0xd0] sm:$0xff]   ;;  %v2318_v58 = vunpack.c.l.bf16 %v2842_v44  ;;  %v2382_v59 = vunpack.c.l.bf16 %v2858_v45  ;;  %v2856_v5 = vld [vmem:[%s4176_s26 + $0xc8] sm:$0xff]   ;;  %v2839_v16 = vld [vmem:[%s4176_s26 + $0x40] sm:$0xff]   ;;  %s4178_s23 = sld [smem:[#allocation6_spill]] }
  0x1f   :  { %2976 = vmatpush3.msra.mxu0 %v2291_v42  ;;  %3011 = vmatpush3.msra.mxu1 %v2355_v43  ;;  %v2833_v60 = vld [vmem:[%s4176_s26 + $0x10] sm:$0xff]   ;;  %v2286_v62 = vunpack.c.l.bf16 %v2834_v48  ;;  %v2350_v63 = vunpack.c.l.bf16 %v2850_v49  ;;  %v2315_v0 = vunpack.c.h.bf16 %v2841_v56  ;;  %v2379_v1 = vunpack.c.h.bf16 %v2857_v57  ;;  %v2832_v8 = vld [vmem:[%s4176_s26 + $0x8] sm:$0xff]   ;;  %v2855_v17 = vld [vmem:[%s4176_s26 + $0xc0] sm:$0xff]   ;;  %s4179_s24 = sld [smem:[#allocation9_spill]] }
  0x20   :  { %2977 = vmatprep.subr.mxu0 %v2322_v46  ;;  %3012 = vmatprep.subr.mxu1 %v2386_v47  ;;  %v2849_v61 = vld [vmem:[%s4176_s26 + $0x90] sm:$0xff]   ;;  %v2283_v2 = vunpack.c.h.bf16 %v2833_v60  ;;  %v2314_v6 = vunpack.c.l.bf16 %v2841_v56  ;;  %v2378_v7 = vunpack.c.l.bf16 %v2857_v57  ;;  %v2848_v9 = vld [vmem:[%s4176_s26 + $0x88] sm:$0xff]   ;;  %v2282_v10 = vunpack.c.l.bf16 %v2833_v60  ;;  %v2273_v20 = vld [vmem:[%s4176_s26] sm:$0xff]   ;;  %s4180_s28 = sld [smem:[#allocation8_spill]] }
  0x21   :  { %2978 = vmatpush3.msra.mxu0 %v2290_v50  ;;  %3013 = vmatpush3.msra.mxu1 %v2354_v51  ;;  %v2347_v3 = vunpack.c.h.bf16 %v2849_v61  ;;  %v2346_v11 = vunpack.c.l.bf16 %v2849_v61  ;;  %v2311_v12 = vunpack.c.h.bf16 %v2840_v4  ;;  %v2375_v13 = vunpack.c.h.bf16 %v2856_v5  ;;  %v2847_v21 = vld [vmem:[%s4176_s26 + $0x80] sm:$0xff]   ;;  %v2866_v33 = vld [vmem:[%s4151_s6 + $0x18] sm:$0xff]   ;;  %v2865_v38 = vld [vmem:[%s4151_s6 + $0x10] sm:$0xff]  }
  0x22   :  { %2979 = vmatprep.subr.mxu0 %v2319_v52  ;;  %3014 = vmatprep.subr.mxu1 %v2383_v53  ;;  %v2279_v14 = vunpack.c.h.bf16 %v2832_v8  ;;  %v2343_v15 = vunpack.c.h.bf16 %v2848_v9  ;;  %v2310_v18 = vunpack.c.l.bf16 %v2840_v4  ;;  %v2374_v19 = vunpack.c.l.bf16 %v2856_v5  ;;  %v2864_v42 = vld [vmem:[%s4151_s6 + $0x8] sm:$0xff]   ;;  %v2409_v45 = vld [vmem:[%s4151_s6] sm:$0xff]   ;;  %s3378_s6 = smov [#allocation2]  }
  0x23   :  { %2980 = vmatpush3.msra.mxu0 %v2287_v54  ;;  %3015 = vmatpush3.msra.mxu1 %v2351_v55  ;;  %v2278_v22 = vunpack.c.l.bf16 %v2832_v8  ;;  %v2342_v23 = vunpack.c.l.bf16 %v2848_v9  ;;  %v2307_v24 = vunpack.c.h.bf16 %v2839_v16  ;;  %v2371_v25 = vunpack.c.h.bf16 %v2855_v17  ;;  %v70_v31 = vld [vmem:[%s4177_s5 + $0x8] sm:$0xff]  ;;  %v72_v34 = vld [vmem:[%s4177_s5 + $0x18] sm:$0xff]  ;;  %v69_v35 = vld [vmem:[%s4177_s5] sm:$0xff]  ;;  %s2245_s1 = sshll.u32 %s3378_s6, 4  ;;  %s2246_s1 = int_to_ptr.vmem [resolvable:$true] %s2245_s1 }
  0x24   :  { %2981 = vmatprep.subr.mxu0 %v2318_v58  ;;  %3016 = vmatprep.subr.mxu1 %v2382_v59  ;;  %v2275_v26 = vunpack.c.h.bf16 %v2273_v20  ;;  %v2339_v27 = vunpack.c.h.bf16 %v2847_v21  ;;  %v2306_v28 = vunpack.c.l.bf16 %v2839_v16  ;;  %v2370_v29 = vunpack.c.l.bf16 %v2855_v17  ;;  %v71_v36 = vld [vmem:[%s4177_s5 + $0x10] sm:$0xff]  ;;  %v446_v49 = vld [vmem:[%s4178_s23] sm:$0xff]  ;;  %p3355_p1 = scmp.lt.s32.totalorder %s2246_s1, %s2246_s1 }
  0x25   :  { %2982 = vmatpush3.msra.mxu0 %v2286_v62  ;;  %3017 = vmatpush3.msra.mxu1 %v2350_v63  ;;  %v2274_v30 = vunpack.c.l.bf16 %v2273_v20  ;;  %v2338_v32 = vunpack.c.l.bf16 %v2847_v21  ;;  %v2423_v37 = vunpack.c.h.bf16 %v2866_v33  ;;  %v2422_v39 = vunpack.c.l.bf16 %v2866_v33  ;;  %v2863_v50 = vld [vmem:[%s4179_s24 + $0x8] sm:$0xff]   ;;  %v2401_v53 = vld [vmem:[%s4179_s24] sm:$0xff]  }
  0x26   :  { %2983 = vmatprep.subr.mxu0 %v2315_v0  ;;  %3018 = vmatprep.subr.mxu1 %v2379_v1  ;;  %v3372_v40 = vmov 0.0   ;;  %vm3373_vm0 = vmmov 0   ;;  %v2419_v41 = vunpack.c.h.bf16 %v2865_v38  ;;  %v2418_v43 = vunpack.c.l.bf16 %v2865_v38  ;;  %v2253_v58 = vld [vmem:[%s4180_s28] ss:$0 sm:$0xff]  ;;  %v2867_v0 = vld [vmem:[%s4153_s8 + $0x8] sm:$0xff]  }
  0x27   :  { %2984 = vmatpush3.msra.mxu0 %v2283_v2  ;;  %3019 = vmatpush3.msra.mxu1 %v2347_v3  ;;  %v2415_v44 = vunpack.c.h.bf16 %v2864_v42  ;;  %v2414_v46 = vunpack.c.l.bf16 %v2864_v42  ;;  %v2411_v47 = vunpack.c.h.bf16 %v2409_v45  ;;  %v2410_v48 = vunpack.c.l.bf16 %v2409_v45  ;;  %v2425_v4 = vld [vmem:[%s4153_s8] sm:$0xff]   ;;  %v2869_v33 = vld [vmem:[%s4156_s11 + $0x8] sm:$0xff]  }
  0x28   :  { %2985 = vmatprep.subr.mxu0 %v2314_v6  ;;  %3020 = vmatprep.subr.mxu1 %v2378_v7  ;;  %vm470_vm1 = vcmask 523264   ;;  %v2407_v51 = vunpack.c.h.bf16 %v2863_v50  ;;  %v2406_v52 = vunpack.c.l.bf16 %v2863_v50  ;;  %v2403_v54 = vunpack.c.h.bf16 %v2401_v53  ;;  %v2256_v8 = vld [vmem:[%s4152_s7] ss:$0 sm:$0xff]  ;;  %s4181_s7 = sld [smem:[#allocation10_spill]] }
  0x29   :  { %2986 = vmatpush3.msra.mxu0 %v2282_v10  ;;  %3021 = vmatpush3.msra.mxu1 %v2346_v11  ;;  %v2402_v55 = vunpack.c.l.bf16 %v2401_v53  ;;  %vm364_vm2 = vcmask 261120   ;;  %v2431_v2 = vunpack.c.h.bf16 %v2867_v0  ;;  %v2430_v5 = vunpack.c.l.bf16 %v2867_v0  ;;  %v2258_v17 = vld [vmem:[%s4154_s9] ss:$0 sm:$0xff] }
  0x2a   :  { %2987 = vmatprep.subr.mxu0 %v2311_v12  ;;  %3022 = vmatprep.subr.mxu1 %v2375_v13  ;;  %v2427_v6 = vunpack.c.h.bf16 %v2425_v4  ;;  %v2426_v7 = vunpack.c.l.bf16 %v2425_v4  ;;  %v823_v50 = vld [vmem:[%s4158_s13 + $0x60] sm:$0xff]  ;;  %vm2217_vm3 = vcmask 523520   ;;  %vm2223_vm4 = vcmask 654848  }
  0x2b   :  { %2988 = vmatpush3.msra.mxu0 %v2279_v14  ;;  %3023 = vmatpush3.msra.mxu1 %v2343_v15  ;;  %vm2229_vm5 = vcmask 720512   ;;  %vm2235_vm6 = vcmask 753344   ;;  %vm2237_vm7 = vcmask 1048288  }
  0x2c   :  { %2989 = vmatprep.subr.mxu0 %v2310_v18  ;;  %3024 = vmatprep.subr.mxu1 %v2374_v19 }
  0x2d   :  { %2990 = vmatpush3.msra.mxu0 %v2278_v22  ;;  %3025 = vmatpush3.msra.mxu1 %v2342_v23 }
  0x2e   :  { %2991 = vmatprep.subr.mxu0 %v2307_v24  ;;  %3026 = vmatprep.subr.mxu1 %v2371_v25  ;;  %v2254_v13 = vld [vmem:[%s4181_s7] ss:$0 sm:$0xff] }
  0x2f   :  { %2992 = vmatpush3.msra.mxu0 %v2275_v26  ;;  %3027 = vmatpush3.msra.mxu1 %v2339_v27  ;;  %v2868_v27 = vld [vmem:[%s4155_s10 + $0x8] sm:$0xff]  }
  0x30   :  { %2993 = vmatprep.subr.mxu0 %v2306_v28  ;;  %3028 = vmatprep.subr.mxu1 %v2370_v29  ;;  %v2439_v28 = vunpack.c.h.bf16 %v2868_v27  ;;  %v2438_v29 = vunpack.c.l.bf16 %v2868_v27 }
  0x31   :  { %2994 = vmatpush3.msra.mxu0 %v2274_v30  ;;  %272 = vmatprep.mubr.f32.mxu0 %v70_v31  ;;  %v2433_v30 = vld [vmem:[%s4155_s10] sm:$0xff]   ;;  %s3374_s10 = smov 32  }
  0x32   :  { %3029 = vmatpush3.msra.mxu1 %v2338_v32  ;;  %342 = vmatprep.mubr.f32.mxu1 %v72_v34  ;;  %v2435_v31 = vunpack.c.h.bf16 %v2433_v30  ;;  %v2434_v32 = vunpack.c.l.bf16 %v2433_v30  ;;  %v2441_v34 = vld [vmem:[%s4156_s11] sm:$0xff]   ;;  %v813_v30 = vld [vmem:[%s4158_s13 + $0x10] sm:$0xff] }
  0x33   :  { %273 = vmatmul.mubr.f32.vlgmr.msra.gmra.mxu0 %v69_v35  ;;  %343 = vmatmul.mubr.f32.vlgmr.msra.gmra.mxu1 %v71_v36  ;;  %v2447_v35 = vunpack.c.h.bf16 %v2869_v33  ;;  %v2446_v36 = vunpack.c.l.bf16 %v2869_v33  ;;  %v2442_v38 = vunpack.c.l.bf16 %v2441_v34 }
  0x34   :  { %3283 = vmatprep.subr.mxu1 %v3372_v40  ;;  %3299 = vmatprep.mubr.msk.f32.mxu1 %vm3373_vm0, %v3372_v40 }
  0x35   :  { %3284 = vmatpush3.msra.mxu1 %v2423_v37  ;;  %3272 = vmatprep.subr.mxu0 %v3372_v40  ;;  %v2443_v37 = vunpack.c.h.bf16 %v2441_v34 }
  0x36   :  { %3285 = vmatprep.subr.mxu1 %v3372_v40  ;;  %3280 = vmatprep.mubr.msk.f32.mxu0 %vm3373_vm0, %v3372_v40 }
  0x37   :  { %3286 = vmatpush3.msra.mxu1 %v2422_v39  ;;  %3273 = vmatpush3.msra.mxu0 %v2407_v51 }
  0x38   :  { %3287 = vmatprep.subr.mxu1 %v3372_v40  ;;  %3274 = vmatprep.subr.mxu0 %v3372_v40 }
  0x39   :  { %3288 = vmatpush3.msra.mxu1 %v2419_v41  ;;  %3275 = vmatpush3.msra.mxu0 %v2406_v52 }
  0x3a   :  { %3289 = vmatprep.subr.mxu1 %v3372_v40  ;;  %3276 = vmatprep.subr.mxu0 %v3372_v40 }
  0x3b   :  { %3290 = vmatpush3.msra.mxu1 %v2418_v43  ;;  %3277 = vmatpush3.msra.mxu0 %v2403_v54 }
  0x3c   :  { %3291 = vmatprep.subr.mxu1 %v3372_v40  ;;  %3278 = vmatprep.subr.mxu0 %v3372_v40 }
  0x3d   :  { %3292 = vmatpush3.msra.mxu1 %v2415_v44  ;;  %3279 = vmatpush3.msra.mxu0 %v2402_v55  ;;  %v824_v55 = vld [vmem:[%s4158_s13 + $0x68] sm:$0xff] }
  0x3e   :  { %3293 = vmatprep.subr.mxu1 %v3372_v40  ;;  %3302 = vmatprep.subr.mxu0 %v3372_v40 }
  0x3f   :  { %3294 = vmatpush3.msra.mxu1 %v2414_v46 }
  0x40   :  { %3295 = vmatprep.subr.mxu1 %v3372_v40 }
  0x41   :  { %3296 = vmatpush3.msra.mxu1 %v2411_v47 }
  0x42   :  { %3297 = vmatprep.subr.mxu1 %v3372_v40 }
  0x43   :  { %3298 = vmatpush3.msra.mxu1 %v2410_v48  ;;  %v829_v48 = vld [vmem:[%s4158_s13 + $0x90] sm:$0xff] }
  0x44   :  { %3300 = vmatmul.mubr.msk.f32.vlgmr.msra.gmra.mxu1 %vm470_vm1, %v446_v49  ;;  %3324 = vmatprep.subr.mxu1 %v3372_v40  ;;  %v830_v49 = vld [vmem:[%s4158_s13 + $0x98] sm:$0xff]  ;;  %v871_v51 = vunpack.c.l.bf16 %v829_v48  ;;  %v872_v52 = vunpack.c.h.bf16 %v829_v48 }
  0x45   :  { %3332 = vmatprep.mubr.msk.f32.mxu1 %vm3373_vm0, %v3372_v40  ;;  %3325 = vmatpush3.msra.mxu1 %v2439_v28  ;;  %v873_v53 = vunpack.c.l.bf16 %v830_v49  ;;  %v874_v54 = vunpack.c.h.bf16 %v830_v49  ;;  %v821_v49 = vld [vmem:[%s4158_s13 + $0x50] sm:$0xff] }
  0x46   :  { %3326 = vmatprep.subr.mxu1 %v3372_v40 }
  0x47   :  { %3327 = vmatpush3.msra.mxu1 %v2438_v29 }
  0x48   :  { %3328 = vmatprep.subr.mxu1 %v3372_v40 }
  0x49   :  { %3329 = vmatpush3.msra.mxu1 %v2435_v31  ;;  %v814_v31 = vld [vmem:[%s4158_s13 + $0x18] sm:$0xff] }
  0x4a   :  { %3330 = vmatprep.subr.mxu1 %v3372_v40 }
  0x4b   :  { %3331 = vmatpush3.msra.mxu1 %v2434_v32 }
  0x4c   :  { %1045 = vmatprep.subr.mxu1 %v874_v54 }
  0xf3   :  { %v2995_v56 = vpop.f32.mrf.mxu0  ;;  %v3030_v57 = vpop.f32.mrf.mxu1 }
  0xf5   :  { %v2996_v59 = vpop.f32.mrf.mxu0  ;;  %v3031_v60 = vpop.f32.mrf.mxu1 }
  0xf6   :  { %v2997_v61 = vadd.f32 %v2996_v59, %v2995_v56  ;;  %v3032_v63 = vadd.f32 %v3031_v60, %v3030_v57  ;;  %v859_v56 = vunpack.c.l.bf16 %v823_v50  ;;  %v860_v57 = vunpack.c.h.bf16 %v823_v50  ;;  %v817_v60 = vld [vmem:[%s4158_s13 + $0x30] sm:$0xff]  ;;  %v822_v50 = vld [vmem:[%s4158_s13 + $0x58] sm:$0xff] }
  0xf7   :  { %v862_v59 = vunpack.c.h.bf16 %v824_v55  ;;  %v847_v0 = vunpack.c.l.bf16 %v817_v60 }
  0xf8   :  { %v275_v62 = vadd.f32 %v2997_v61, %v2253_v58  ;;  %v861_v58 = vunpack.c.l.bf16 %v824_v55  ;;  %v818_v61 = vld [vmem:[%s4158_s13 + $0x38] sm:$0xff]  ;;  %v815_v55 = vld [vmem:[%s4158_s13 + $0x20] sm:$0xff] }
  0xfa   :  { %v345_v1 = vadd.f32 %v3032_v63, %v275_v62  ;;  %v848_v62 = vunpack.c.h.bf16 %v817_v60  ;;  %v850_v63 = vunpack.c.h.bf16 %v818_v61  ;;  %v857_v60 = vunpack.c.l.bf16 %v822_v50 }
  0xfc   :  { %v348_v3 = vmax.f32 %v345_v1, 0.0  ;;  %v849_v1 = vunpack.c.l.bf16 %v818_v61  ;;  %v844_v61 = vunpack.c.h.bf16 %v815_v55 }
  0xfe   :  { %3281 = vmatmul.mubr.msk.f32.vlgmr.msra.gmra.mxu0 %vm364_vm2, %v348_v3  ;;  %v812_v3 = vld [vmem:[%s4158_s13 + $0x8] sm:$0xff] }
  0xff   :  { %3303 = vmatpush3.msra.mxu0 %v2431_v2  ;;  %3310 = vmatprep.mubr.msk.f32.mxu0 %vm3373_vm0, %v3372_v40  ;;  %v811_v2 = vld [vmem:[%s4158_s13] sm:$0xff] }
 0x100   :  { %3304 = vmatprep.subr.mxu0 %v3372_v40  ;;  %v836_v4 = vunpack.c.h.bf16 %v811_v2 }
 0x101   :  { %3305 = vmatpush3.msra.mxu0 %v2430_v5  ;;  %v838_v5 = vunpack.c.h.bf16 %v812_v3 }
 0x102   :  { %3306 = vmatprep.subr.mxu0 %v3372_v40 }
 0x103   :  { %3307 = vmatpush3.msra.mxu0 %v2427_v6  ;;  %v835_v6 = vunpack.c.l.bf16 %v811_v2 }
 0x104   :  { %v540_v9 = vpop.f32.mrf.mxu1  ;;  %3308 = vmatprep.subr.mxu0 %v3372_v40 }
 0x105   :  { %v541_v10 = vadd.f32 %v2256_v8, %v540_v9  ;;  %3309 = vmatpush3.msra.mxu0 %v2426_v7  ;;  %v837_v7 = vunpack.c.l.bf16 %v812_v3  ;;  %v831_v8 = vld [vmem:[%s4158_s13 + $0xa0] sm:$0xff]  ;;  %v832_v9 = vld [vmem:[%s4158_s13 + $0xa8] sm:$0xff]  ;;  %v2876_v3 = vld [vmem:[%s4160_s15 + $0x38] sm:$0xff]  }
 0x106   :  { %v3301_v11 = vpop.f32.mrf.mxu1  ;;  %3313 = vmatprep.subr.mxu0 %v3372_v40 }
 0x107   :  { %v544_v12 = vmax.f32 %v541_v10, 0.0  ;;  %v876_v10 = vunpack.c.h.bf16 %v831_v8  ;;  %v878_v11 = vunpack.c.h.bf16 %v832_v9 }
 0x109   :  { %3311 = vmatmul.mubr.msk.f32.vlgmr.msra.gmra.mxu0 %vm364_vm2, %v544_v12 }
 0x10a   :  { %3321 = vmatprep.mubr.msk.f32.mxu0 %vm3373_vm0, %v3372_v40  ;;  %3314 = vmatpush3.msra.mxu0 %v2447_v35 }
 0x10b   :  { %3315 = vmatprep.subr.mxu0 %v3372_v40 }
 0x10c   :  { %3316 = vmatpush3.msra.mxu0 %v2446_v36  ;;  %v840_v36 = vunpack.c.h.bf16 %v813_v30 }
 0x10d   :  { %3317 = vmatprep.subr.mxu0 %v3372_v40 }
 0x10e   :  { %3318 = vmatpush3.msra.mxu0 %v2443_v37  ;;  %v842_v37 = vunpack.c.h.bf16 %v814_v31 }
 0x10f   :  { %3319 = vmatprep.subr.mxu0 %v3372_v40 }
 0x110   :  { %3320 = vmatpush3.msra.mxu0 %v2442_v38  ;;  %v839_v38 = vunpack.c.l.bf16 %v813_v30 }
 0x111   :  { %974 = vmatprep.subr.mxu0 %v872_v52 }
 0x1be   :  { %v434_v14 = vpop.f32.mrf.mxu0 }
 0x1bf   :  { %v435_v15 = vadd.f32 %v2254_v13, %v434_v14 }
 0x1c0   :  { %v3282_v16 = vpop.f32.mrf.mxu0 }
 0x1c1   :  { %3342 = vtanh.f32 %v435_v15  ;;  %v2262_v16 = vld [vmem:[%s4157_s12] ss:$0 sm:$0xff] }
 0x1c9   :  { %v629_v18 = vpop.f32.mrf.mxu0 }
 0x1ca   :  { %v630_v19 = vadd.f32 %v2258_v17, %v629_v18  ;;  %v825_v17 = vld [vmem:[%s4158_s13 + $0x70] sm:$0xff]  ;;  %v826_v18 = vld [vmem:[%s4158_s13 + $0x78] sm:$0xff] }
 0x1cb   :  { %v3312_v20 = vpop.f32.mrf.mxu0  ;;  %v866_v27 = vunpack.c.h.bf16 %v826_v18  ;;  %v863_v28 = vunpack.c.l.bf16 %v825_v17  ;;  %v865_v29 = vunpack.c.l.bf16 %v826_v18 }
 0x1cc   :  { %3344 = vtanh.f32 %v630_v19 }
 0x1ce   :  { %v3343_v21 = vpop.eup %3342 }
 0x1cf   :  { %v439_v22 = vmul.f32 %v3343_v21, %v3343_v21 }
 0x1d1   :  { %v440_v23 = vsel %vm364_vm2, %v439_v22, 0.0  ;;  %v877_v22 = vunpack.c.l.bf16 %v832_v9  ;;  %v2883_v9 = vld [vmem:[%s4160_s15 + $0x70] sm:$0xff]  }
 0x1d2   :  { %441 = vadd.xlane.f32.xlu0 %v440_v23  ;;  %v819_v23 = vld [vmem:[%s4158_s13 + $0x40] sm:$0xff] }
 0x1d3   :  { %v852_v32 = vunpack.c.h.bf16 %v819_v23  ;;  %v851_v34 = vunpack.c.l.bf16 %v819_v23  ;;  %v2506_v23 = vunpack.c.l.bf16 %v2883_v9 }
 0x1d9   :  { %v3345_v24 = vpop.eup %3344 }
 0x1da   :  { %v634_v25 = vmul.f32 %v3345_v24, %v3345_v24 }
 0x1dc   :  { %v635_v26 = vsel %vm364_vm2, %v634_v25, 0.0 }
 0x1dd   :  { %636 = vadd.xlane.f32.xlu0 %v635_v26  ;;  %v864_v26 = vunpack.c.h.bf16 %v825_v17  ;;  %v2507_v17 = vunpack.c.h.bf16 %v2883_v9 }
 0x25b   :  { %v442_v39 = vpop.xlane.xlu0 %441 }
 0x25c   :  { %v443_v41 = vmax.f32 %v442_v39, 1e-24  ;;  %v833_v39 = vld [vmem:[%s4158_s13 + $0xb0] sm:$0xff] }
 0x25e   :  { %3346 = vrsqrt.f32 %v443_v41  ;;  %v834_v41 = vld [vmem:[%s4158_s13 + $0xb8] sm:$0xff] }
 0x25f   :  { %v881_v48 = vunpack.c.l.bf16 %v834_v41 }
 0x266   :  { %v637_v42 = vpop.xlane.xlu0 %636 }
 0x267   :  { %v638_v43 = vmax.f32 %v637_v42, 1e-24  ;;  %v841_v42 = vunpack.c.l.bf16 %v814_v31 }
 0x269   :  { %3348 = vrsqrt.f32 %v638_v43  ;;  %v827_v43 = vld [vmem:[%s4158_s13 + $0x80] sm:$0xff] }
 0x26b   :  { %v3347_v44 = vpop.eup %3346 }
 0x26c   :  { %v445_v45 = vmul.f32 %v3347_v44, %v3343_v21  ;;  %v875_v21 = vunpack.c.l.bf16 %v831_v8  ;;  %v828_v44 = vld [vmem:[%s4158_s13 + $0x88] sm:$0xff] }
 0x26d   :  { %v870_v52 = vunpack.c.h.bf16 %v828_v44  ;;  %v869_v54 = vunpack.c.l.bf16 %v828_v44 }
 0x26e   :  { %3333 = vmatmul.mubr.msk.f32.vlgmr.msra.gmra.mxu1 %vm364_vm2, %v445_v45  ;;  %2213 = vst.msk [vmem:[#allocation2] sm:$0xff] %vm364_vm2, %v445_v45  ;;  %v880_v45 = vunpack.c.h.bf16 %v833_v39 }
 0x26f   :  { %1085 = vmatprep.mubr.f32.mxu1 %v3372_v40  ;;  %1046 = vmatpush1.msra.mxu1 %v873_v53  ;;  %v867_v53 = vunpack.c.l.bf16 %v827_v43 }
 0x270   :  { %1047 = vmatprep.subr.mxu1 %v862_v59  ;;  %v855_v59 = vunpack.c.l.bf16 %v821_v49 }
 0x271   :  { %1048 = vmatpush1.msra.mxu1 %v861_v58  ;;  %v858_v58 = vunpack.c.h.bf16 %v822_v50  ;;  %v2872_v50 = vld [vmem:[%s4160_s15 + $0x18] sm:$0xff]  }
 0x272   :  { %1049 = vmatprep.subr.mxu1 %v850_v63  ;;  %v843_v63 = vunpack.c.l.bf16 %v815_v55 }
 0x273   :  { %1050 = vmatpush1.msra.mxu1 %v849_v1  ;;  %v2900_v1 = vld [vmem:[%s4160_s15 + $0xf8] sm:$0xff]  }
 0x274   :  { %1051 = vmatprep.subr.mxu1 %v838_v5 }
 0x275   :  { %1052 = vmatpush1.msra.mxu1 %v837_v7  ;;  %v2479_v7 = vunpack.c.h.bf16 %v2876_v3 }
 0x276   :  { %v3349_v46 = vpop.eup %3348  ;;  %1187 = vmatprep.subr.mxu1 %v878_v11 }
 0x277   :  { %v640_v47 = vmul.f32 %v3349_v46, %v3345_v24  ;;  %v820_v24 = vld [vmem:[%s4158_s13 + $0x48] sm:$0xff]  ;;  %v882_v46 = vunpack.c.h.bf16 %v834_v41 }
 0x278   :  { %v854_v33 = vunpack.c.h.bf16 %v820_v24  ;;  %v853_v35 = vunpack.c.l.bf16 %v820_v24 }
 0x279   :  { %2214 = vrot.lane.b32.xlu1 %v640_v47, %s3374_s10  ;;  %3322 = vmatmul.mubr.msk.f32.vlgmr.msra.gmra.mxu0 %vm364_vm2, %v640_v47  ;;  %v879_v47 = vunpack.c.l.bf16 %v833_v39 }
 0x27a   :  { %1014 = vmatprep.mubr.f32.mxu0 %v3372_v40  ;;  %975 = vmatpush1.msra.mxu0 %v871_v51  ;;  %v868_v51 = vunpack.c.h.bf16 %v827_v43 }
 0x27b   :  { %976 = vmatprep.subr.mxu0 %v860_v57  ;;  %v856_v57 = vunpack.c.h.bf16 %v821_v49 }
 0x27c   :  { %977 = vmatpush1.msra.mxu0 %v859_v56  ;;  %v816_v56 = vld [vmem:[%s4158_s13 + $0x28] sm:$0xff] }
 0x27d   :  { %978 = vmatprep.subr.mxu0 %v848_v62  ;;  %v846_v62 = vunpack.c.h.bf16 %v816_v56  ;;  %v845_v2 = vunpack.c.l.bf16 %v816_v56  ;;  %v2463_v56 = vunpack.c.h.bf16 %v2872_v50 }
 0x27e   :  { %979 = vmatpush1.msra.mxu0 %v847_v0  ;;  %v2884_v0 = vld [vmem:[%s4160_s15 + $0x78] sm:$0xff]  }
 0x27f   :  { %980 = vmatprep.subr.mxu0 %v836_v4  ;;  %v2892_v4 = vld [vmem:[%s4160_s15 + $0xb8] sm:$0xff]   ;;  %v2511_v5 = vunpack.c.h.bf16 %v2884_v0  ;;  %v2510_v11 = vunpack.c.l.bf16 %v2884_v0  ;;  %v2462_v0 = vunpack.c.l.bf16 %v2872_v50 }
 0x280   :  { %981 = vmatpush1.msra.mxu0 %v835_v6  ;;  %v2575_v6 = vunpack.c.h.bf16 %v2900_v1  ;;  %v2543_v8 = vunpack.c.h.bf16 %v2892_v4 }
 0x281   :  { %1116 = vmatprep.subr.mxu0 %v876_v10  ;;  %v2899_v10 = vld [vmem:[%s4160_s15 + $0xf0] sm:$0xff]  }
 0x282   :  { %v2571_v18 = vunpack.c.h.bf16 %v2899_v10  ;;  %v2570_v24 = vunpack.c.l.bf16 %v2899_v10 }
 0x2eb   :  { %v2215_v12 = vpop.permute.xlu1 %2214 }
 0x2ec   :  { %2218 = vst.msk [vmem:[#allocation2] sm:$0xff] %vm2217_vm3, %v2215_v12  ;;  %v2574_v12 = vunpack.c.l.bf16 %v2900_v1 }
 0x32e   :  { %v799_v13 = vpop.f32.mrf.mxu1 }
 0x330   :  { %v3334_v14 = vpop.f32.mrf.mxu1 }
 0x331   :  { %v2891_v14 = vld [vmem:[%s4160_s15 + $0xb0] sm:$0xff]  }
 0x339   :  { %v726_v15 = vpop.f32.mrf.mxu0 }
 0x33a   :  { %v800_v19 = vadd.f32 %v799_v13, %v726_v15  ;;  %v2875_v13 = vld [vmem:[%s4160_s15 + $0x30] sm:$0xff]   ;;  %v2478_v15 = vunpack.c.l.bf16 %v2876_v3 }
 0x33b   :  { %v3323_v20 = vpop.f32.mrf.mxu0 }
 0x33c   :  { %v3736_v25 = vadd.f32 %v2262_v16, %v800_v19  ;;  %v2542_v16 = vunpack.c.l.bf16 %v2892_v4  ;;  %v2475_v19 = vunpack.c.h.bf16 %v2875_v13  ;;  %v2539_v20 = vunpack.c.h.bf16 %v2891_v14 }
 0x33e   :  { %2263 = vmatmul.mubr.msk.f32.vlgmr.msra.gmra.mxu0 %vm364_vm2, %v3736_v25  ;;  %2264 = vmatmul.mubr.msk.f32.vlgmr.msra.gmra.mxu1 %vm364_vm2, %v3736_v25 }
 0x33f   :  { %1117 = vmatpush1.msra.mxu0 %v875_v21  ;;  %1188 = vmatpush1.msra.mxu1 %v877_v22  ;;  %v2882_v21 = vld [vmem:[%s4160_s15 + $0x68] sm:$0xff]  }
 0x340   :  { %1118 = vmatprep.subr.mxu0 %v864_v26  ;;  %1189 = vmatprep.subr.mxu1 %v866_v27  ;;  %v2898_v22 = vld [vmem:[%s4160_s15 + $0xe8] sm:$0xff]   ;;  %v2474_v27 = vunpack.c.l.bf16 %v2875_v13 }
 0x341   :  { %1119 = vmatpush1.msra.mxu0 %v863_v28  ;;  %1190 = vmatpush1.msra.mxu1 %v865_v29  ;;  %v2890_v26 = vld [vmem:[%s4160_s15 + $0xa8] sm:$0xff]   ;;  %v2538_v28 = vunpack.c.l.bf16 %v2891_v14  ;;  %v2503_v29 = vunpack.c.h.bf16 %v2882_v21  ;;  %v2567_v30 = vunpack.c.h.bf16 %v2898_v22 }
 0x342   :  { %1120 = vmatprep.subr.mxu0 %v852_v32  ;;  %1191 = vmatprep.subr.mxu1 %v854_v33  ;;  %v2535_v32 = vunpack.c.h.bf16 %v2890_v26  ;;  %v2881_v33 = vld [vmem:[%s4160_s15 + $0x60] sm:$0xff]   ;;  %v2534_v41 = vunpack.c.l.bf16 %v2890_v26  ;;  %v2870_v14 = vld [vmem:[%s4160_s15 + $0x8] sm:$0xff]  }
 0x343   :  { %1121 = vmatpush1.msra.mxu0 %v851_v34  ;;  %1192 = vmatpush1.msra.mxu1 %v853_v35  ;;  %v2897_v34 = vld [vmem:[%s4160_s15 + $0xe0] sm:$0xff]   ;;  %v2502_v35 = vunpack.c.l.bf16 %v2882_v21 }
 0x344   :  { %1122 = vmatprep.subr.mxu0 %v840_v36  ;;  %1193 = vmatprep.subr.mxu1 %v842_v37  ;;  %v2566_v36 = vunpack.c.l.bf16 %v2898_v22  ;;  %v2873_v37 = vld [vmem:[%s4160_s15 + $0x20] sm:$0xff]   ;;  %v2563_v43 = vunpack.c.h.bf16 %v2897_v34  ;;  %v2562_v49 = vunpack.c.l.bf16 %v2897_v34  ;;  %v2915_v34 = vld [vmem:[%s4162_s17 + $0x78] sm:$0xff]  }
 0x345   :  { %1123 = vmatpush1.msra.mxu0 %v839_v38  ;;  %1156 = vmatprep.mubr.f32.mxu0 %v3372_v40  ;;  %v2889_v38 = vld [vmem:[%s4160_s15 + $0xa0] sm:$0xff]   ;;  %v2467_v44 = vunpack.c.h.bf16 %v2873_v37 }
 0x346   :  { %1194 = vmatpush1.msra.mxu1 %v841_v42  ;;  %1227 = vmatprep.mubr.f32.mxu1 %v3372_v40  ;;  %v2499_v42 = vunpack.c.h.bf16 %v2881_v33  ;;  %v2877_v22 = vld [vmem:[%s4160_s15 + $0x40] sm:$0xff]  }
 0x347   :  { %2265 = vmatmul.mubr.msk.f32.vlgmr.msra.gmra.mxu0 %vm364_vm2, %v3736_v25  ;;  %2266 = vmatmul.mubr.msk.f32.vlgmr.msra.gmra.mxu1 %vm364_vm2, %v3736_v25  ;;  %v2449_v26 = vld [vmem:[%s4160_s15] sm:$0xff]  }
 0x348   :  { %1258 = vmatprep.subr.mxu0 %v880_v45  ;;  %1329 = vmatprep.subr.mxu1 %v882_v46  ;;  %v2531_v45 = vunpack.c.h.bf16 %v2889_v38  ;;  %v2880_v46 = vld [vmem:[%s4160_s15 + $0x58] sm:$0xff]  }
 0x349   :  { %1259 = vmatpush1.msra.mxu0 %v879_v47  ;;  %1330 = vmatpush1.msra.mxu1 %v881_v48  ;;  %v2896_v47 = vld [vmem:[%s4160_s15 + $0xd8] sm:$0xff]   ;;  %v2498_v48 = vunpack.c.l.bf16 %v2881_v33 }
 0x34a   :  { %1260 = vmatprep.subr.mxu0 %v868_v51  ;;  %1331 = vmatprep.subr.mxu1 %v870_v52  ;;  %v2888_v51 = vld [vmem:[%s4160_s15 + $0x98] sm:$0xff]   ;;  %v2466_v52 = vunpack.c.l.bf16 %v2873_v37  ;;  %v2559_v55 = vunpack.c.h.bf16 %v2896_v47 }
 0x34b   :  { %1261 = vmatpush1.msra.mxu0 %v867_v53  ;;  %1332 = vmatpush1.msra.mxu1 %v869_v54  ;;  %v2530_v53 = vunpack.c.l.bf16 %v2889_v38  ;;  %v2495_v54 = vunpack.c.h.bf16 %v2880_v46  ;;  %v2526_v1 = vunpack.c.l.bf16 %v2888_v51  ;;  %v887_v38 = vlaneseq }
 0x34c   :  { %1262 = vmatprep.subr.mxu0 %v856_v57  ;;  %1333 = vmatprep.subr.mxu1 %v858_v58  ;;  %v2527_v57 = vunpack.c.h.bf16 %v2888_v51  ;;  %v2879_v58 = vld [vmem:[%s4160_s15 + $0x50] sm:$0xff]  }
 0x34d   :  { %1263 = vmatpush1.msra.mxu0 %v855_v59  ;;  %1334 = vmatpush1.msra.mxu1 %v857_v60  ;;  %v2895_v59 = vld [vmem:[%s4160_s15 + $0xd0] sm:$0xff]   ;;  %v2494_v60 = vunpack.c.l.bf16 %v2880_v46 }
 0x34e   :  { %1264 = vmatprep.subr.mxu0 %v844_v61  ;;  %1335 = vmatprep.subr.mxu1 %v846_v62  ;;  %v2558_v61 = vunpack.c.l.bf16 %v2896_v47  ;;  %v2871_v62 = vld [vmem:[%s4160_s15 + $0x10] sm:$0xff]   ;;  %v2555_v3 = vunpack.c.h.bf16 %v2895_v59  ;;  %v2554_v9 = vunpack.c.l.bf16 %v2895_v59 }
 0x34f   :  { %1265 = vmatpush1.msra.mxu0 %v843_v63  ;;  %1298 = vmatprep.mubr.f32.mxu0 %v3372_v40  ;;  %v2887_v63 = vld [vmem:[%s4160_s15 + $0x90] sm:$0xff]   ;;  %v2459_v4 = vunpack.c.h.bf16 %v2871_v62  ;;  %v2458_v10 = vunpack.c.l.bf16 %v2871_v62 }
 0x350   :  { %1336 = vmatpush1.msra.mxu1 %v845_v2  ;;  %1369 = vmatprep.mubr.f32.mxu1 %v3372_v40  ;;  %v2491_v2 = vunpack.c.h.bf16 %v2879_v58 }
 0x351   :  { %2267 = vmatmul.mubr.msk.f32.vlgmr.msra.gmra.mxu0 %vm364_vm2, %v3736_v25  ;;  %2268 = vmatmul.mubr.msk.f32.vlgmr.msra.gmra.mxu1 %vm364_vm2, %v3736_v25  ;;  %v2874_v25 = vld [vmem:[%s4160_s15 + $0x28] sm:$0xff]  }
 0x352   :  { %3062 = vmatprep.subr.mxu0 %v2511_v5  ;;  %3097 = vmatprep.subr.mxu1 %v2575_v6  ;;  %v2471_v31 = vunpack.c.h.bf16 %v2874_v25  ;;  %v2470_v39 = vunpack.c.l.bf16 %v2874_v25  ;;  %v2523_v5 = vunpack.c.h.bf16 %v2887_v63  ;;  %v2878_v6 = vld [vmem:[%s4160_s15 + $0x48] sm:$0xff]  }
 0x353   :  { %3063 = vmatpush3.msra.mxu0 %v2479_v7  ;;  %3098 = vmatpush3.msra.mxu1 %v2543_v8  ;;  %v2894_v7 = vld [vmem:[%s4160_s15 + $0xc8] sm:$0xff]   ;;  %v2490_v8 = vunpack.c.l.bf16 %v2879_v58 }
 0x354   :  { %3064 = vmatprep.subr.mxu0 %v2510_v11  ;;  %3099 = vmatprep.subr.mxu1 %v2574_v12  ;;  %v2522_v11 = vunpack.c.l.bf16 %v2887_v63  ;;  %v2487_v12 = vunpack.c.h.bf16 %v2878_v6  ;;  %v2551_v13 = vunpack.c.h.bf16 %v2894_v7 }
 0x355   :  { %3065 = vmatpush3.msra.mxu0 %v2478_v15  ;;  %3100 = vmatpush3.msra.mxu1 %v2542_v16  ;;  %v2886_v15 = vld [vmem:[%s4160_s15 + $0x88] sm:$0xff]   ;;  %v2455_v16 = vunpack.c.h.bf16 %v2870_v14 }
 0x356   :  { %3066 = vmatprep.subr.mxu0 %v2507_v17  ;;  %3101 = vmatprep.subr.mxu1 %v2571_v18  ;;  %v2519_v17 = vunpack.c.h.bf16 %v2886_v15  ;;  %v2486_v18 = vunpack.c.l.bf16 %v2878_v6  ;;  %v2518_v21 = vunpack.c.l.bf16 %v2886_v15  ;;  %v2638_v6 = vunpack.c.l.bf16 %v2915_v34 }
 0x357   :  { %3067 = vmatpush3.msra.mxu0 %v2475_v19  ;;  %3102 = vmatpush3.msra.mxu1 %v2539_v20  ;;  %v2550_v19 = vunpack.c.l.bf16 %v2894_v7  ;;  %v2454_v20 = vunpack.c.l.bf16 %v2870_v14 }
 0x358   :  { %3068 = vmatprep.subr.mxu0 %v2506_v23  ;;  %3103 = vmatprep.subr.mxu1 %v2570_v24  ;;  %v2893_v23 = vld [vmem:[%s4160_s15 + $0xc0] sm:$0xff]   ;;  %v2483_v24 = vunpack.c.h.bf16 %v2877_v22 }
 0x359   :  { %3069 = vmatpush3.msra.mxu0 %v2474_v27  ;;  %3104 = vmatpush3.msra.mxu1 %v2538_v28  ;;  %v2547_v25 = vunpack.c.h.bf16 %v2893_v23  ;;  %v2885_v27 = vld [vmem:[%s4160_s15 + $0x80] sm:$0xff]   ;;  %v2482_v28 = vunpack.c.l.bf16 %v2877_v22  ;;  %v2913_v22 = vld [vmem:[%s4162_s17 + $0x68] sm:$0xff]  }
 0x35a   :  { %3070 = vmatprep.subr.mxu0 %v2503_v29  ;;  %3105 = vmatprep.subr.mxu1 %v2567_v30  ;;  %v2451_v29 = vunpack.c.h.bf16 %v2449_v26  ;;  %v2515_v30 = vunpack.c.h.bf16 %v2885_v27  ;;  %v2514_v33 = vunpack.c.l.bf16 %v2885_v27 }
 0x35b   :  { %3071 = vmatpush3.msra.mxu0 %v2471_v31  ;;  %3106 = vmatpush3.msra.mxu1 %v2535_v32  ;;  %v2546_v31 = vunpack.c.l.bf16 %v2893_v23  ;;  %v2450_v32 = vunpack.c.l.bf16 %v2449_v26  ;;  %v2929_v23 = vld [vmem:[%s4162_s17 + $0xe8] sm:$0xff]  }
 0x35c   :  { %3072 = vmatprep.subr.mxu0 %v2502_v35  ;;  %3107 = vmatprep.subr.mxu1 %v2566_v36  ;;  %v2931_v35 = vld [vmem:[%s4162_s17 + $0xf8] sm:$0xff]   ;;  %v2639_v36 = vunpack.c.h.bf16 %v2915_v34 }
 0x35d   :  { %3073 = vmatpush3.msra.mxu0 %v2470_v39  ;;  %3108 = vmatpush3.msra.mxu1 %v2534_v41  ;;  %v2703_v37 = vunpack.c.h.bf16 %v2931_v35  ;;  %v3886_v39 = vshrl.u32 %v887_v38, 7  ;;  %v2702_v7 = vunpack.c.l.bf16 %v2931_v35  ;;  %v2912_v38 = vld [vmem:[%s4162_s17 + $0x60] sm:$0xff]  }
 0x35e   :  { %3074 = vmatprep.subr.mxu0 %v2499_v42  ;;  %3109 = vmatprep.subr.mxu1 %v2563_v43  ;;  %v3893_v43 = vld [vmem:[%s4159_s14] sm:$0xff] }
 0x35f   :  { %3075 = vmatpush3.msra.mxu0 %v2467_v44  ;;  %3110 = vmatpush3.msra.mxu1 %v2531_v45  ;;  %v889_v41 = vsub.s32 0, %v3886_v39  ;;  %v897_v42 = vsub.s32 2, %v3886_v39  ;;  %v893_v44 = vsub.s32 1, %v3886_v39  ;;  %v901_v45 = vsub.s32 3, %v3886_v39 }
 0x360   :  { %3076 = vmatprep.subr.mxu0 %v2498_v48  ;;  %3111 = vmatprep.subr.mxu1 %v2562_v49 }
 0x361   :  { %3077 = vmatpush3.msra.mxu0 %v2466_v52  ;;  %3112 = vmatpush3.msra.mxu1 %v2530_v53  ;;  %v890_v46 = vrot.slane %v3893_v43, %v889_v41  ;;  %v898_v47 = vrot.slane %v3893_v43, %v897_v42  ;;  %v894_v48 = vrot.slane %v3893_v43, %v893_v44 }
 0x362   :  { %3078 = vmatprep.subr.mxu0 %v2495_v54  ;;  %3113 = vmatprep.subr.mxu1 %v2559_v55  ;;  %v902_v49 = vrot.slane %v3893_v43, %v901_v45 }
 0x363   :  { %3079 = vmatpush3.msra.mxu0 %v2463_v56  ;;  %3114 = vmatpush3.msra.mxu1 %v2527_v57  ;;  %v2907_v56 = vld [vmem:[%s4162_s17 + $0x38] sm:$0xff]  }
 0x364   :  { %3080 = vmatprep.subr.mxu0 %v2494_v60  ;;  %3115 = vmatprep.subr.mxu1 %v2558_v61  ;;  %v2923_v57 = vld [vmem:[%s4162_s17 + $0xb8] sm:$0xff]   ;;  %v909_v60 = vsub.s32 5, %v3886_v39  ;;  %v917_v61 = vsub.s32 7, %v3886_v39 }
 0x365   :  { %3081 = vmatpush3.msra.mxu0 %v2462_v0  ;;  %3116 = vmatpush3.msra.mxu1 %v2526_v1  ;;  %v2607_v0 = vunpack.c.h.bf16 %v2907_v56  ;;  %v2671_v1 = vunpack.c.h.bf16 %v2923_v57 }
 0x366   :  { %3082 = vmatprep.subr.mxu0 %v2491_v2  ;;  %3117 = vmatprep.subr.mxu1 %v2555_v3  ;;  %v2914_v2 = vld [vmem:[%s4162_s17 + $0x70] sm:$0xff]  }
 0x367   :  { %3083 = vmatpush3.msra.mxu0 %v2459_v4  ;;  %3118 = vmatpush3.msra.mxu1 %v2523_v5  ;;  %v2930_v3 = vld [vmem:[%s4162_s17 + $0xf0] sm:$0xff]   ;;  %v2635_v14 = vunpack.c.h.bf16 %v2914_v2 }
 0x368   :  { %3084 = vmatprep.subr.mxu0 %v2490_v8  ;;  %3119 = vmatprep.subr.mxu1 %v2554_v9  ;;  %v2906_v8 = vld [vmem:[%s4162_s17 + $0x30] sm:$0xff]   ;;  %v2699_v15 = vunpack.c.h.bf16 %v2930_v3 }
 0x369   :  { %3085 = vmatpush3.msra.mxu0 %v2458_v10  ;;  %3120 = vmatpush3.msra.mxu1 %v2522_v11  ;;  %v2922_v9 = vld [vmem:[%s4162_s17 + $0xb0] sm:$0xff]   ;;  %v2606_v10 = vunpack.c.l.bf16 %v2907_v56  ;;  %v2670_v11 = vunpack.c.l.bf16 %v2923_v57  ;;  %v2602_v26 = vunpack.c.l.bf16 %v2906_v8  ;;  %v2911_v57 = vld [vmem:[%s4162_s17 + $0x58] sm:$0xff]  }
 0x36a   :  { %3086 = vmatprep.subr.mxu0 %v2487_v12  ;;  %3121 = vmatprep.subr.mxu1 %v2551_v13  ;;  %v910_v12 = vrot.slane %v3893_v43, %v909_v60  ;;  %v918_v13 = vrot.slane %v3893_v43, %v917_v61  ;;  %v2666_v27 = vunpack.c.l.bf16 %v2922_v9  ;;  %v2903_v61 = vld [vmem:[%s4162_s17 + $0x18] sm:$0xff]  }
 0x36b   :  { %3087 = vmatpush3.msra.mxu0 %v2455_v16  ;;  %3122 = vmatpush3.msra.mxu1 %v2519_v17 }
 0x36c   :  { %3088 = vmatprep.subr.mxu0 %v2486_v18  ;;  %3123 = vmatprep.subr.mxu1 %v2550_v19  ;;  %v2603_v18 = vunpack.c.h.bf16 %v2906_v8  ;;  %v2667_v19 = vunpack.c.h.bf16 %v2922_v9  ;;  %v2902_v9 = vld [vmem:[%s4162_s17 + $0x10] sm:$0xff]  }
 0x36d   :  { %3089 = vmatpush3.msra.mxu0 %v2454_v20  ;;  %3124 = vmatpush3.msra.mxu1 %v2518_v21  ;;  %v2634_v20 = vunpack.c.l.bf16 %v2914_v2  ;;  %v2698_v21 = vunpack.c.l.bf16 %v2930_v3  ;;  %v2591_v3 = vunpack.c.h.bf16 %v2903_v61 }
 0x36e   :  { %3090 = vmatprep.subr.mxu0 %v2483_v24  ;;  %3125 = vmatprep.subr.mxu1 %v2547_v25 }
 0x36f   :  { %3091 = vmatpush3.msra.mxu0 %v2451_v29  ;;  %3126 = vmatpush3.msra.mxu1 %v2515_v30  ;;  %v2921_v29 = vld [vmem:[%s4162_s17 + $0xa8] sm:$0xff]  }
 0x370   :  { %3092 = vmatprep.subr.mxu0 %v2482_v28  ;;  %3127 = vmatprep.subr.mxu1 %v2546_v31  ;;  %v2905_v28 = vld [vmem:[%s4162_s17 + $0x28] sm:$0xff]  }
 0x371   :  { %3093 = vmatpush3.msra.mxu0 %v2450_v32  ;;  %3128 = vmatpush3.msra.mxu1 %v2514_v33  ;;  %v2631_v32 = vunpack.c.h.bf16 %v2913_v22  ;;  %v2695_v33 = vunpack.c.h.bf16 %v2929_v23 }
 0x372   :  { %3132 = vmatprep.subr.mxu0 %v2639_v36  ;;  %3167 = vmatprep.subr.mxu1 %v2703_v37  ;;  %v2599_v36 = vunpack.c.h.bf16 %v2905_v28  ;;  %v2663_v37 = vunpack.c.h.bf16 %v2921_v29 }
 0x3fe   :  { %v1016_v50 = vpop.f32.mrf.mxu0  ;;  %v1087_v51 = vpop.f32.mrf.mxu1 }
 0x3ff   :  { %v1017_v52 = vadd.f32 %v1016_v50, %v890_v46  ;;  %v1088_v53 = vadd.f32 %v1087_v51, %v898_v47  ;;  %v2928_v46 = vld [vmem:[%s4162_s17 + $0xe0] sm:$0xff]   ;;  %v2630_v47 = vunpack.c.l.bf16 %v2913_v22  ;;  %v2598_v51 = vunpack.c.l.bf16 %v2905_v28 }
 0x400   :  { %v1018_v54 = vpop.f32.mrf.mxu0  ;;  %v1089_v55 = vpop.f32.mrf.mxu1  ;;  %v2920_v50 = vld [vmem:[%s4162_s17 + $0xa0] sm:$0xff]   ;;  %v2690_v60 = vunpack.c.l.bf16 %v2928_v46  ;;  %v913_v22 = vsub.s32 6, %v3886_v39 }
 0x401   :  { %v1019_v58 = vadd.f32 %v1018_v54, %v894_v48  ;;  %v1090_v59 = vadd.f32 %v1089_v55, %v902_v49  ;;  %v1376_v4 = vmax.f32 %v1017_v52, 0.0  ;;  %v1378_v5 = vmax.f32 %v1088_v53, 0.0  ;;  %v2904_v49 = vld [vmem:[%s4162_s17 + $0x20] sm:$0xff]  }
 0x402   :  { %v2694_v48 = vunpack.c.l.bf16 %v2929_v23  ;;  %v2662_v52 = vunpack.c.l.bf16 %v2921_v29  ;;  %v2627_v53 = vunpack.c.h.bf16 %v2912_v38  ;;  %v2691_v54 = vunpack.c.h.bf16 %v2928_v46 }
 0x403   :  { %v1377_v62 = vmax.f32 %v1019_v58, 0.0  ;;  %v1379_v63 = vmax.f32 %v1090_v59, 0.0  ;;  %v2595_v55 = vunpack.c.h.bf16 %v2904_v49  ;;  %v2659_v56 = vunpack.c.h.bf16 %v2920_v50  ;;  %v2927_v58 = vld [vmem:[%s4162_s17 + $0xd8] sm:$0xff]  }
 0x404   :  { %v2626_v59 = vunpack.c.l.bf16 %v2912_v38  ;;  %v2687_v2 = vunpack.c.h.bf16 %v2927_v58  ;;  %v2686_v8 = vunpack.c.l.bf16 %v2927_v58 }
 0x405   :  { %1587 = vmatprep.mubr.f32.mxu0 %v1377_v62  ;;  %1657 = vmatprep.mubr.f32.mxu1 %v1379_v63  ;;  %v2919_v62 = vld [vmem:[%s4162_s17 + $0x98] sm:$0xff]   ;;  %v2594_v63 = vunpack.c.l.bf16 %v2904_v49  ;;  %v2916_v49 = vld [vmem:[%s4162_s17 + $0x80] sm:$0xff]  }
 0x406   :  { %1588 = vmatmul.mubr.f32.vlgmr.msra.gmra.mxu0 %v1376_v4  ;;  %1658 = vmatmul.mubr.f32.vlgmr.msra.gmra.mxu1 %v1378_v5  ;;  %v2655_v4 = vunpack.c.h.bf16 %v2919_v62  ;;  %v2910_v5 = vld [vmem:[%s4162_s17 + $0x50] sm:$0xff]   ;;  %v2643_v58 = vunpack.c.h.bf16 %v2916_v49 }
 0x407   :  { %v3931_v16 = vpop.f32.mrf.mxu0  ;;  %v3933_v17 = vpop.f32.mrf.mxu1  ;;  %3133 = vmatpush3.msra.mxu0 %v2607_v0  ;;  %3168 = vmatpush3.msra.mxu1 %v2671_v1  ;;  %v2658_v0 = vunpack.c.l.bf16 %v2920_v50  ;;  %v2623_v1 = vunpack.c.h.bf16 %v2911_v57  ;;  %v2618_v23 = vunpack.c.l.bf16 %v2910_v5  ;;  %v4018_v50 = vld [vmem:[%s4159_s14 + $0x8] sm:$0xf] }
 0x408   :  { %3134 = vmatprep.subr.mxu0 %v2638_v6  ;;  %3169 = vmatprep.subr.mxu1 %v2702_v7  ;;  %v2926_v6 = vld [vmem:[%s4162_s17 + $0xd0] sm:$0xff]   ;;  %v2622_v7 = vunpack.c.l.bf16 %v2911_v57 }
 0x409   :  { %v1160_v24 = vpop.f32.mrf.mxu0  ;;  %v1231_v25 = vpop.f32.mrf.mxu1  ;;  %3135 = vmatpush3.msra.mxu0 %v2606_v10  ;;  %3170 = vmatpush3.msra.mxu1 %v2670_v11  ;;  %v2918_v10 = vld [vmem:[%s4162_s17 + $0x90] sm:$0xff]   ;;  %v2590_v11 = vunpack.c.l.bf16 %v2903_v61 }
 0x40a   :  { %v1161_v30 = vadd.f32 %v1160_v24, %v910_v12  ;;  %v1232_v31 = vadd.f32 %v1231_v25, %v918_v13  ;;  %3136 = vmatprep.subr.mxu0 %v2635_v14  ;;  %3171 = vmatprep.subr.mxu1 %v2699_v15  ;;  %v2654_v12 = vunpack.c.l.bf16 %v2919_v62  ;;  %v2619_v13 = vunpack.c.h.bf16 %v2910_v5  ;;  %v2901_v25 = vld [vmem:[%s4162_s17 + $0x8] sm:$0xff]  }
 0x40b   :  { %3137 = vmatpush3.msra.mxu0 %v2603_v18  ;;  %3172 = vmatpush3.msra.mxu1 %v2667_v19  ;;  %v2683_v14 = vunpack.c.h.bf16 %v2926_v6  ;;  %v2587_v15 = vunpack.c.h.bf16 %v2902_v9  ;;  %v2651_v18 = vunpack.c.h.bf16 %v2918_v10  ;;  %v2909_v19 = vld [vmem:[%s4162_s17 + $0x48] sm:$0xff]   ;;  %v2682_v24 = vunpack.c.l.bf16 %v2926_v6 }
 0x40c   :  { %v1381_v34 = vmax.f32 %v1161_v30, 0.0  ;;  %v1383_v35 = vmax.f32 %v1232_v31, 0.0  ;;  %3138 = vmatprep.subr.mxu0 %v2634_v20  ;;  %3173 = vmatprep.subr.mxu1 %v2698_v21  ;;  %v2925_v20 = vld [vmem:[%s4162_s17 + $0xc8] sm:$0xff]   ;;  %v905_v21 = vsub.s32 4, %v3886_v39  ;;  %v2650_v28 = vunpack.c.l.bf16 %v2918_v10  ;;  %v2945_v10 = vld [vmem:[%s4164_s19 + $0x70] sm:$0xff]  }
 0x40d   :  { %3139 = vmatpush3.msra.mxu0 %v2602_v26  ;;  %3174 = vmatpush3.msra.mxu1 %v2666_v27  ;;  %v2917_v26 = vld [vmem:[%s4162_s17 + $0x88] sm:$0xff]   ;;  %v2586_v27 = vunpack.c.l.bf16 %v2902_v9  ;;  %v2615_v29 = vunpack.c.h.bf16 %v2909_v19  ;;  %v2679_v30 = vunpack.c.h.bf16 %v2925_v20  ;;  %v2614_v46 = vunpack.c.l.bf16 %v2909_v19 }
 0x40e   :  { %1862 = vmatprep.mubr.f32.mxu0 %v1381_v34  ;;  %1932 = vmatprep.mubr.f32.mxu1 %v1383_v35  ;;  %v2908_v34 = vld [vmem:[%s4162_s17 + $0x40] sm:$0xff]  }
 0x40f   :  { %3140 = vmatprep.subr.mxu0 %v2631_v32  ;;  %3175 = vmatprep.subr.mxu1 %v2695_v33  ;;  %v2583_v32 = vunpack.c.h.bf16 %v2901_v25  ;;  %v2647_v33 = vunpack.c.h.bf16 %v2917_v26  ;;  %v2924_v35 = vld [vmem:[%s4162_s17 + $0xc0] sm:$0xff]  }
 0x410   :  { %3141 = vmatpush3.msra.mxu0 %v2599_v36  ;;  %3176 = vmatpush3.msra.mxu1 %v2663_v37  ;;  %v906_v36 = vrot.slane %v3893_v43, %v905_v21  ;;  %v914_v37 = vrot.slane %v3893_v43, %v913_v22  ;;  %v2582_v43 = vunpack.c.l.bf16 %v2901_v25  ;;  %v2674_v62 = vunpack.c.l.bf16 %v2924_v35 }
 0x411   :  { %3142 = vmatprep.subr.mxu0 %v2630_v47  ;;  %3177 = vmatprep.subr.mxu1 %v2694_v48  ;;  %v3997_v31 = vpop.f32.mrf.mxu0  ;;  %v4007_v38 = vpop.f32.mrf.mxu1  ;;  %v2678_v47 = vunpack.c.l.bf16 %v2925_v20  ;;  %v2577_v48 = vld [vmem:[%s4162_s17] sm:$0xff]   ;;  %v2763_v22 = vunpack.c.h.bf16 %v2945_v10 }
 0x412   :  { %3143 = vmatpush3.msra.mxu0 %v2598_v51  ;;  %3178 = vmatpush3.msra.mxu1 %v2662_v52  ;;  %v2646_v51 = vunpack.c.l.bf16 %v2917_v26  ;;  %v926_v52 = vrot.slane %v4018_v50, %v893_v44  ;;  %v2579_v57 = vunpack.c.h.bf16 %v2577_v48  ;;  %v2610_v44 = vunpack.c.l.bf16 %v2908_v34  ;;  %v2944_v26 = vld [vmem:[%s4164_s19 + $0x68] sm:$0xff]  }
 0x413   :  { %3144 = vmatprep.subr.mxu0 %v2627_v53  ;;  %3179 = vmatprep.subr.mxu1 %v2691_v54  ;;  %v2611_v53 = vunpack.c.h.bf16 %v2908_v34  ;;  %v2675_v54 = vunpack.c.h.bf16 %v2924_v35  ;;  %v1373_v61 = vpop.f32.mrf.mxu1  ;;  %v2759_v35 = vunpack.c.h.bf16 %v2944_v26 }
 0x414   :  { %3145 = vmatpush3.msra.mxu0 %v2595_v55  ;;  %3180 = vmatpush3.msra.mxu1 %v2659_v56  ;;  %v1302_v55 = vpop.f32.mrf.mxu0  ;;  %v934_v56 = vrot.slane %v4018_v50, %v901_v45  ;;  %v2962_v45 = vld [vmem:[%s4164_s19 + $0xf8] sm:$0xff]  }
 0x415   :  { %3146 = vmatprep.subr.mxu0 %v2626_v59  ;;  %3181 = vmatprep.subr.mxu1 %v2690_v60  ;;  %v1159_v59 = vadd.f32 %v3931_v16, %v906_v36  ;;  %v1230_v60 = vadd.f32 %v3933_v17, %v914_v37  ;;  %v2938_v16 = vld [vmem:[%s4164_s19 + $0x38] sm:$0xff]   ;;  %v1303_v17 = vadd.f32 %v1302_v55, %v926_v52  ;;  %v2831_v5 = vunpack.c.h.bf16 %v2962_v45  ;;  %v2951_v52 = vld [vmem:[%s4164_s19 + $0xa0] sm:$0xff]  }
 0x416   :  { %3147 = vmatpush3.msra.mxu0 %v2594_v63  ;;  %3182 = vmatpush3.msra.mxu1 %v2658_v0  ;;  %v2946_v63 = vld [vmem:[%s4164_s19 + $0x78] sm:$0xff]   ;;  %v2578_v0 = vunpack.c.l.bf16 %v2577_v48  ;;  %v2734_v20 = vunpack.c.l.bf16 %v2938_v16  ;;  %v2959_v48 = vld [vmem:[%s4164_s19 + $0xe0] sm:$0xff]  }
 0x417   :  { %3148 = vmatprep.subr.mxu0 %v2623_v1  ;;  %3183 = vmatprep.subr.mxu1 %v2687_v2  ;;  %v2642_v1 = vunpack.c.l.bf16 %v2916_v49  ;;  %v2954_v2 = vld [vmem:[%s4164_s19 + $0xb8] sm:$0xff]   ;;  %v1380_v6 = vmax.f32 %v1159_v59, 0.0  ;;  %v2758_v49 = vunpack.c.l.bf16 %v2944_v26 }
 0x418   :  { %3149 = vmatpush3.msra.mxu0 %v2591_v3  ;;  %3184 = vmatpush3.msra.mxu1 %v2655_v4  ;;  %v1374_v3 = vadd.f32 %v1373_v61, %v934_v56  ;;  %v2767_v4 = vunpack.c.h.bf16 %v2946_v63  ;;  %v2799_v9 = vunpack.c.h.bf16 %v2954_v2  ;;  %v2798_v21 = vunpack.c.l.bf16 %v2954_v2  ;;  %v2942_v59 = vld [vmem:[%s4164_s19 + $0x58] sm:$0xff]  }
 0x419   :  { %3150 = vmatprep.subr.mxu0 %v2622_v7  ;;  %3185 = vmatprep.subr.mxu1 %v2686_v8  ;;  %v1382_v7 = vmax.f32 %v1230_v60, 0.0  ;;  %v2735_v8 = vunpack.c.h.bf16 %v2938_v16  ;;  %v2819_v56 = vunpack.c.h.bf16 %v2959_v48  ;;  %v2958_v60 = vld [vmem:[%s4164_s19 + $0xd8] sm:$0xff]  }
 0x41a   :  { %3151 = vmatpush3.msra.mxu0 %v2590_v11  ;;  %3186 = vmatpush3.msra.mxu1 %v2654_v12  ;;  %v2961_v11 = vld [vmem:[%s4164_s19 + $0xf0] sm:$0xff]   ;;  %v1385_v12 = vmax.f32 %v1303_v17, 0.0  ;;  %v1387_v19 = vmax.f32 %v1374_v3, 0.0  ;;  %v2815_v16 = vunpack.c.h.bf16 %v2958_v60 }
 0x41b   :  { %3152 = vmatprep.subr.mxu0 %v2619_v13  ;;  %3187 = vmatprep.subr.mxu1 %v2683_v14  ;;  %v2766_v13 = vunpack.c.l.bf16 %v2946_v63  ;;  %v2830_v14 = vunpack.c.l.bf16 %v2962_v45  ;;  %v2950_v63 = vld [vmem:[%s4164_s19 + $0x98] sm:$0xff]   ;;  %v2941_v3 = vld [vmem:[%s4164_s19 + $0x50] sm:$0xff]  }
 0x41c   :  { %3153 = vmatpush3.msra.mxu0 %v2587_v15  ;;  %3188 = vmatpush3.msra.mxu1 %v2651_v18  ;;  %v2937_v15 = vld [vmem:[%s4164_s19 + $0x30] sm:$0xff]   ;;  %v2783_v2 = vunpack.c.h.bf16 %v2950_v63 }
 0x41d   :  { %3154 = vmatprep.subr.mxu0 %v2618_v23  ;;  %3189 = vmatprep.subr.mxu1 %v2682_v24  ;;  %v2953_v18 = vld [vmem:[%s4164_s19 + $0xb0] sm:$0xff]   ;;  %v2827_v23 = vunpack.c.h.bf16 %v2961_v11  ;;  %v2731_v24 = vunpack.c.h.bf16 %v2937_v15 }
 0x41e   :  { %3155 = vmatpush3.msra.mxu0 %v2586_v27  ;;  %3190 = vmatpush3.msra.mxu1 %v2650_v28  ;;  %v2795_v25 = vunpack.c.h.bf16 %v2953_v18  ;;  %v2960_v27 = vld [vmem:[%s4164_s19 + $0xe8] sm:$0xff]   ;;  %v2762_v28 = vunpack.c.l.bf16 %v2945_v10  ;;  %v2794_v34 = vunpack.c.l.bf16 %v2953_v18  ;;  %v2782_v10 = vunpack.c.l.bf16 %v2950_v63 }
 0x41f   :  { %3156 = vmatprep.subr.mxu0 %v2615_v29  ;;  %3191 = vmatprep.subr.mxu1 %v2679_v30  ;;  %v2826_v29 = vunpack.c.l.bf16 %v2961_v11  ;;  %v2936_v30 = vld [vmem:[%s4164_s19 + $0x28] sm:$0xff]   ;;  %v2823_v36 = vunpack.c.h.bf16 %v2960_v27  ;;  %v2747_v11 = vunpack.c.h.bf16 %v2941_v3 }
 0x420   :  { %3157 = vmatpush3.msra.mxu0 %v2583_v32  ;;  %3192 = vmatpush3.msra.mxu1 %v2647_v33  ;;  %v2952_v32 = vld [vmem:[%s4164_s19 + $0xa8] sm:$0xff]   ;;  %v2730_v33 = vunpack.c.l.bf16 %v2937_v15  ;;  %v2727_v37 = vunpack.c.h.bf16 %v2936_v30 }
 0x421   :  { %3158 = vmatprep.subr.mxu0 %v2614_v46  ;;  %3193 = vmatprep.subr.mxu1 %v2678_v47  ;;  %v2791_v46 = vunpack.c.h.bf16 %v2952_v32  ;;  %v2943_v47 = vld [vmem:[%s4164_s19 + $0x60] sm:$0xff]   ;;  %v2940_v15 = vld [vmem:[%s4164_s19 + $0x48] sm:$0xff]  }
 0x422   :  { %3159 = vmatpush3.msra.mxu0 %v2582_v43  ;;  %3194 = vmatpush3.msra.mxu1 %v2646_v51  ;;  %v2822_v43 = vunpack.c.l.bf16 %v2960_v27  ;;  %v2935_v51 = vld [vmem:[%s4164_s19 + $0x20] sm:$0xff]   ;;  %v2755_v55 = vunpack.c.h.bf16 %v2943_v47  ;;  %v2754_v61 = vunpack.c.l.bf16 %v2943_v47  ;;  %v2956_v18 = vld [vmem:[%s4164_s19 + $0xc8] sm:$0xff]  }
 0x423   :  { %3160 = vmatprep.subr.mxu0 %v2611_v53  ;;  %3195 = vmatprep.subr.mxu1 %v2675_v54  ;;  %v2726_v53 = vunpack.c.l.bf16 %v2936_v30  ;;  %v2790_v54 = vunpack.c.l.bf16 %v2952_v32  ;;  %v2722_v45 = vunpack.c.l.bf16 %v2935_v51  ;;  %v2807_v26 = vunpack.c.h.bf16 %v2956_v18  ;;  %v2955_v30 = vld [vmem:[%s4164_s19 + $0xc0] sm:$0xff]  }
 0x424   :  { %3161 = vmatpush3.msra.mxu0 %v2579_v57  ;;  %3196 = vmatpush3.msra.mxu1 %v2643_v58  ;;  %v2723_v57 = vunpack.c.h.bf16 %v2935_v51  ;;  %v2787_v58 = vunpack.c.h.bf16 %v2951_v52  ;;  %v922_v32 = vrot.slane %v4018_v50, %v889_v41  ;;  %v2802_v51 = vunpack.c.l.bf16 %v2955_v30 }
 0x425   :  { %3162 = vmatprep.subr.mxu0 %v2610_v44  ;;  %3197 = vmatprep.subr.mxu1 %v2674_v62  ;;  %v2818_v44 = vunpack.c.l.bf16 %v2959_v48  ;;  %v2934_v62 = vld [vmem:[%s4164_s19 + $0x18] sm:$0xff]  }
 0x426   :  { %3163 = vmatpush3.msra.mxu0 %v2578_v0  ;;  %3198 = vmatpush3.msra.mxu1 %v2642_v1  ;;  %v2786_v0 = vunpack.c.l.bf16 %v2951_v52  ;;  %v2751_v1 = vunpack.c.h.bf16 %v2942_v59  ;;  %v2719_v17 = vunpack.c.h.bf16 %v2934_v62  ;;  %v1301_v48 = vadd.f32 %v3997_v31, %v922_v32 }
 0x427   :  { %1863 = vmatmul.mubr.f32.vlgmr.msra.gmra.mxu0 %v1380_v6  ;;  %1933 = vmatmul.mubr.f32.vlgmr.msra.gmra.mxu1 %v1382_v7  ;;  %v2814_v6 = vunpack.c.l.bf16 %v2958_v60  ;;  %v2933_v7 = vld [vmem:[%s4164_s19 + $0x10] sm:$0xff]  }
 0x428   :  { %3202 = vmatprep.subr.mxu0 %v2767_v4  ;;  %3237 = vmatprep.subr.mxu1 %v2831_v5  ;;  %v2957_v4 = vld [vmem:[%s4164_s19 + $0xd0] sm:$0xff]   ;;  %v2750_v5 = vunpack.c.l.bf16 %v2942_v59 }
 0x429   :  { %3203 = vmatpush3.msra.mxu0 %v2735_v8  ;;  %2137 = vmatprep.mubr.f32.mxu0 %v1385_v12  ;;  %v2949_v8 = vld [vmem:[%s4164_s19 + $0x90] sm:$0xff]   ;;  %v2811_v12 = vunpack.c.h.bf16 %v2957_v4 }
 0x42a   :  { %3238 = vmatpush3.msra.mxu1 %v2799_v9  ;;  %2207 = vmatprep.mubr.f32.mxu1 %v1387_v19  ;;  %v2718_v9 = vunpack.c.l.bf16 %v2934_v62  ;;  %v2746_v19 = vunpack.c.l.bf16 %v2941_v3 }
 0x42b   :  { %3204 = vmatprep.subr.mxu0 %v2766_v13  ;;  %3239 = vmatprep.subr.mxu1 %v2830_v14  ;;  %v2715_v13 = vunpack.c.h.bf16 %v2933_v7  ;;  %v2779_v14 = vunpack.c.h.bf16 %v2949_v8 }
 0x42c   :  { %3205 = vmatpush3.msra.mxu0 %v2734_v20  ;;  %3240 = vmatpush3.msra.mxu1 %v2798_v21  ;;  %v2810_v20 = vunpack.c.l.bf16 %v2957_v4  ;;  %v2932_v21 = vld [vmem:[%s4164_s19 + $0x8] sm:$0xff]  }
 0x42d   :  { %3206 = vmatprep.subr.mxu0 %v2763_v22  ;;  %3241 = vmatprep.subr.mxu1 %v2827_v23  ;;  %v2948_v22 = vld [vmem:[%s4164_s19 + $0x88] sm:$0xff]   ;;  %v2714_v23 = vunpack.c.l.bf16 %v2933_v7  ;;  %v2711_v27 = vunpack.c.h.bf16 %v2932_v21 }
 0x42e   :  { %3207 = vmatpush3.msra.mxu0 %v2731_v24  ;;  %3242 = vmatpush3.msra.mxu1 %v2795_v25  ;;  %v2778_v24 = vunpack.c.l.bf16 %v2949_v8  ;;  %v2743_v25 = vunpack.c.h.bf16 %v2940_v15  ;;  %v2774_v41 = vunpack.c.l.bf16 %v2948_v22 }
 0x42f   :  { %3208 = vmatprep.subr.mxu0 %v2762_v28  ;;  %3243 = vmatprep.subr.mxu1 %v2826_v29  ;;  %v2775_v28 = vunpack.c.h.bf16 %v2948_v22  ;;  %v2939_v29 = vld [vmem:[%s4164_s19 + $0x40] sm:$0xff]  }
 0x430   :  { %3209 = vmatpush3.msra.mxu0 %v2730_v33  ;;  %3244 = vmatpush3.msra.mxu1 %v2794_v34  ;;  %v930_v33 = vrot.slane %v4018_v50, %v897_v42  ;;  %v2742_v34 = vunpack.c.l.bf16 %v2940_v15  ;;  %v2739_v39 = vunpack.c.h.bf16 %v2939_v29  ;;  %v2803_v42 = vunpack.c.h.bf16 %v2955_v30 }
 0x431   :  { %3210 = vmatprep.subr.mxu0 %v2759_v35  ;;  %3245 = vmatprep.subr.mxu1 %v2823_v36  ;;  %v2806_v35 = vunpack.c.l.bf16 %v2956_v18  ;;  %v2705_v36 = vld [vmem:[%s4164_s19] sm:$0xff]  }
 0x432   :  { %3211 = vmatpush3.msra.mxu0 %v2727_v37  ;;  %3246 = vmatpush3.msra.mxu1 %v2791_v46  ;;  %v2947_v37 = vld [vmem:[%s4164_s19 + $0x80] sm:$0xff]   ;;  %v2710_v46 = vunpack.c.l.bf16 %v2932_v21  ;;  %v2707_v50 = vunpack.c.h.bf16 %v2705_v36  ;;  %v2706_v52 = vunpack.c.l.bf16 %v2705_v36 }
 0x433   :  { %3212 = vmatprep.subr.mxu0 %v2758_v49  ;;  %3247 = vmatprep.subr.mxu1 %v2822_v43  ;;  %v2771_v47 = vunpack.c.h.bf16 %v2947_v37  ;;  %v1372_v49 = vadd.f32 %v4007_v38, %v930_v33  ;;  %v2738_v43 = vunpack.c.l.bf16 %v2939_v29 }
 0x434   :  { %3213 = vmatpush3.msra.mxu0 %v2726_v53  ;;  %3248 = vmatpush3.msra.mxu1 %v2790_v54  ;;  %v2770_v53 = vunpack.c.l.bf16 %v2947_v37  ;;  %v1384_v54 = vmax.f32 %v1301_v48, 0.0 }
 0x435   :  { %3214 = vmatprep.subr.mxu0 %v2755_v55  ;;  %3249 = vmatprep.subr.mxu1 %v2819_v56  ;;  %v1386_v55 = vmax.f32 %v1372_v49, 0.0  ;;  %v2269_v56 = vld [vmem:[%s4161_s16] ss:$0 sm:$0xff]  ;;  %s3376_s16 = smov 80  }
 0x436   :  { %3215 = vmatpush3.msra.mxu0 %v2723_v57  ;;  %3250 = vmatpush3.msra.mxu1 %v2787_v58 }
 0x437   :  { %3216 = vmatprep.subr.mxu0 %v2754_v61  ;;  %3251 = vmatprep.subr.mxu1 %v2818_v44 }
 0x438   :  { %3217 = vmatpush3.msra.mxu0 %v2722_v45  ;;  %3252 = vmatpush3.msra.mxu1 %v2786_v0  ;;  %v2270_v45 = vld [vmem:[%s4163_s18] ss:$0 sm:$0xff]  ;;  %s3377_s18 = smov 88  }
 0x439   :  { %3218 = vmatprep.subr.mxu0 %v2751_v1  ;;  %3253 = vmatprep.subr.mxu1 %v2815_v16 }
 0x43a   :  { %3219 = vmatpush3.msra.mxu0 %v2719_v17  ;;  %3254 = vmatpush3.msra.mxu1 %v2783_v2 }
 0x43b   :  { %3220 = vmatprep.subr.mxu0 %v2750_v5  ;;  %3255 = vmatprep.subr.mxu1 %v2814_v6  ;;  %v2271_v6 = vld [vmem:[%s4165_s20] ss:$0 sm:$0xff]  ;;  %s3350_s20 = scalar_lea.vmem %s2246_s1, 128 }
 0x43c   :  { %3221 = vmatpush3.msra.mxu0 %v2718_v9  ;;  %3256 = vmatpush3.msra.mxu1 %v2782_v10  ;;  %p3351_p0 = scmp.ne.s32.totalorder %s2246_s1, %s3350_s20  ;;  %p3356_p2 = scmp.lt.s32.totalorder %s3350_s20, %s3350_s20 }
 0x43d   :  { %3222 = vmatprep.subr.mxu0 %v2747_v11  ;;  %3257 = vmatprep.subr.mxu1 %v2811_v12 }
 0x43e   :  { %3223 = vmatpush3.msra.mxu0 %v2715_v13  ;;  %3258 = vmatpush3.msra.mxu1 %v2779_v14  ;;  %p3357_p3 = por %p3356_p2, %p3355_p1 }
 0x43f   :  { %3224 = vmatprep.subr.mxu0 %v2746_v19  ;;  %3259 = vmatprep.subr.mxu1 %v2810_v20 }
 0x440   :  { %3225 = vmatpush3.msra.mxu0 %v2714_v23  ;;  %3260 = vmatpush3.msra.mxu1 %v2778_v24  ;;  %p3358_p4 = pnand %p3357_p3, %p3351_p0 }
 0x441   :  { %3226 = vmatprep.subr.mxu0 %v2743_v25  ;;  %3261 = vmatprep.subr.mxu1 %v2807_v26 }
 0x442   :  { %3227 = vmatpush3.msra.mxu0 %v2711_v27  ;;  %3262 = vmatpush3.msra.mxu1 %v2775_v28 }
 0x443   :  { %3228 = vmatprep.subr.mxu0 %v2742_v34  ;;  %3263 = vmatprep.subr.mxu1 %v2806_v35 }
 0x444   :  { %3229 = vmatpush3.msra.mxu0 %v2710_v46  ;;  %3264 = vmatpush3.msra.mxu1 %v2774_v41 }
 0x445   :  { %3230 = vmatprep.subr.mxu0 %v2739_v39  ;;  %3265 = vmatprep.subr.mxu1 %v2803_v42 }
 0x446   :  { %3231 = vmatpush3.msra.mxu0 %v2707_v50  ;;  %3266 = vmatpush3.msra.mxu1 %v2771_v47 }
 0x447   :  { %3232 = vmatprep.subr.mxu0 %v2738_v43  ;;  %3267 = vmatprep.subr.mxu1 %v2802_v51 }
 0x448   :  { %3233 = vmatpush3.msra.mxu0 %v2706_v52  ;;  %3268 = vmatpush3.msra.mxu1 %v2770_v53 }
 0x449   :  { %2138 = vmatmul.mubr.f32.vlgmr.msra.gmra.mxu0 %v1384_v54  ;;  %2208 = vmatmul.mubr.f32.vlgmr.msra.gmra.mxu1 %v1386_v55 }
 0x4c6   :  { %v3094_v31 = vpop.f32.mrf.mxu0  ;;  %v3129_v38 = vpop.f32.mrf.mxu1 }
 0x4c8   :  { %v3095_v57 = vpop.f32.mrf.mxu0  ;;  %v3130_v58 = vpop.f32.mrf.mxu1 }
 0x4c9   :  { %v3096_v59 = vadd.f32 %v3095_v57, %v3094_v31  ;;  %v3131_v61 = vadd.f32 %v3130_v58, %v3129_v38 }
 0x4cb   :  { %v1590_v60 = vadd.f32 %v3096_v59, %v2269_v56 }
 0x4cd   :  { %v1660_v44 = vadd.f32 %v3131_v61, %v1590_v60 }
 0x4cf   :  { %2220 = vrot.lane.b32.xlu1 %v1660_v44, %s3375_s22 }
 0x4e7   :  { %v3164_v62 = vpop.f32.mrf.mxu0  ;;  %v3199_v63 = vpop.f32.mrf.mxu1 }
 0x4e9   :  { %v3165_v0 = vpop.f32.mrf.mxu0  ;;  %v3200_v1 = vpop.f32.mrf.mxu1 }
 0x4ea   :  { %v3166_v16 = vadd.f32 %v3165_v0, %v3164_v62  ;;  %v3201_v2 = vadd.f32 %v3200_v1, %v3199_v63 }
 0x4ec   :  { %v1865_v17 = vadd.f32 %v3166_v16, %v2270_v45 }
 0x4ee   :  { %v1935_v3 = vadd.f32 %v3201_v2, %v1865_v17 }
 0x4f0   :  { %2226 = vrot.lane.b32.xlu0 %v1935_v3, %s3376_s16 }
 0x509   :  { %v3234_v4 = vpop.f32.mrf.mxu0  ;;  %v3269_v5 = vpop.f32.mrf.mxu1 }
 0x50b   :  { %v3235_v7 = vpop.f32.mrf.mxu0  ;;  %v3270_v8 = vpop.f32.mrf.mxu1 }
 0x50c   :  { %v3236_v9 = vadd.f32 %v3235_v7, %v3234_v4  ;;  %v3271_v11 = vadd.f32 %v3270_v8, %v3269_v5 }
 0x50e   :  { %v2140_v10 = vadd.f32 %v3236_v9, %v2271_v6 }
 0x510   :  { %v2210_v12 = vadd.f32 %v3271_v11, %v2140_v10 }
 0x512   :  { %2232 = vrot.lane.b32.xlu1 %v2210_v12, %s3377_s18 }
 0x541   :  { %v2221_v13 = vpop.permute.xlu1 %2220 }
 0x542   :  { %2224 = vst.msk [vmem:[#allocation2] sm:$0xff] %vm2223_vm4, %v2221_v13 }
 0x562   :  { %v2227_v14 = vpop.permute.xlu0 %2226 }
 0x563   :  { %2230 = vst.msk [vmem:[#allocation2] sm:$0xff] %vm2229_vm5, %v2227_v14 }
 0x584   :  { %v2233_v15 = vpop.permute.xlu1 %2232 }
 0x585   :  { %2236 = vst.msk [vmem:[#allocation2] sm:$0xff] %vm2235_vm6, %v2233_v15 }
 0x586   :  { %2238 = vst.msk [vmem:[#allocation2] sm:$0xff] %vm2237_vm7, %v3372_v40 }
 0x587   :  { %3361 = shalt.err (!%p3358_p4)
}
 0x588   :  { %2248 = dma.vmem_to_hbm [thread:$0]  %s2246_s1, 128, %s4166_s21, [#allocation3]  }
 0x589   :  { %3370 = dma.done.wait [#allocation3], 128  }
 0x58a   :  { %3371 = vsyncadd [#allocation3], 4294967168 }
 0x58b   :  { %2252 = vsyncpa [#allocation3], 1 }

</bundles_post_ra>
